<compile_context>
chip_gen: v7x
topology: tpu7x:2x2x1
jax: 0.10.0
libtpu: 0.0.40
codegen_flags: <defaults>
</compile_context>

<pallas_src>
import functools

import jax
import jax.numpy as jnp
from jax.experimental import pallas as pl
from jax.experimental.pallas import tpu as pltpu


def _label_smoothing_kernel(pred_ref, target_ref, out_ref, *, classes, smoothing, batch):
    """One batch tile in natural (tile_b, C) layout; accumulates into (1,1) out.

    pred_ref:   (TB, C) native dtype (f32 or bf16) VMEM
    target_ref: (TB, 1) int32 VMEM
    out_ref:    (1, 1)  float32 VMEM  (resident accumulator across grid steps)
    """
    @pl.when(pl.program_id(0) == 0)
    def _():
        out_ref[...] = jnp.zeros_like(out_ref)

    confidence = jnp.float32(1.0 - smoothing)
    off_value = jnp.float32(smoothing / (classes - 1))
    inv_b = jnp.float32(1.0 / batch)

    x = pred_ref[...].astype(jnp.float32)                        # (TB, C)
    tb, c = x.shape

    # Numerically stable logsumexp along the class (lane) axis.
    row_max = jnp.max(x, axis=1, keepdims=True)                  # (TB, 1)
    sum_x = jnp.sum(x, axis=1, keepdims=True)                    # (TB, 1)
    lse = jnp.log(jnp.sum(jnp.exp(x - row_max), axis=1, keepdims=True))  # (TB, 1)

    # sum_c logp = sum_c x - C * (row_max + lse)   (logp never materialized)
    sum_logp = sum_x - jnp.float32(c) * (row_max + lse)          # (TB, 1)

    # logp at the target class: one-hot select on x, reduce, shift.
    col_ids = jax.lax.broadcasted_iota(jnp.int32, (tb, c), 1)    # (TB, C)
    one_hot = col_ids == target_ref[...]                         # (TB,1) -> (TB,C)
    x_at_tgt = jnp.sum(jnp.where(one_hot, x, 0.0), axis=1, keepdims=True)
    logp_at_tgt = x_at_tgt - row_max - lse                       # (TB, 1)

    # Smoothed cross entropy per sample, then fold the 1/B mean in here.
    per_sample = -(off_value * sum_logp + (confidence - off_value) * logp_at_tgt)
    out_ref[...] += jnp.sum(per_sample, axis=0, keepdims=True) * inv_b


def _choose_tile_b(batch, classes, itemsize):
    """Default: single grid step.  Only tile for very large pred blocks."""
    block_bytes = batch * classes * itemsize
    if block_bytes <= (4 << 20):          # per-step overhead dominates; one step
        return batch
    for tb in (32768, 16384, 8192, 4096, 2048):
        if batch % tb == 0:
            return tb
    return batch


def label_smoothing_loss(pred, target, *, classes=10, smoothing=0.0, tile_b=None):
    """pred: (B, C) float32/bfloat16 logits, target: (B,) int class ids."""
    B, C = pred.shape
    assert C == classes, "class axis must match `classes`"

    # Tiny: B int32s, minor-dim reshape only (no pred-sized HBM round trip).
    target2d = target.astype(jnp.int32).reshape(B, 1)

    if tile_b is None:
        tile_b = _choose_tile_b(B, C, pred.dtype.itemsize)
    assert B % tile_b == 0, "batch must be divisible by the batch tile"
    assert tile_b == B or tile_b % 8 == 0, "tiled batch blocks must be sublane-aligned"
    num_tiles = B // tile_b

    kernel = functools.partial(
        _label_smoothing_kernel, classes=classes, smoothing=smoothing, batch=B
    )

    cost = pl.CostEstimate(
        flops=8 * B * C,
        transcendentals=B * (C + 1),
        bytes_accessed=B * C * pred.dtype.itemsize + B * 4 + 4,
    )

    out = pl.pallas_call(
        kernel,
        out_shape=jax.ShapeDtypeStruct((1, 1), jnp.float32),
        grid=(num_tiles,),
        in_specs=[
            pl.BlockSpec((tile_b, C), lambda i: (i, 0)),   # pred tile (natural layout)
            pl.BlockSpec((tile_b, 1), lambda i: (i, 0)),   # target tile
        ],
        # Same (1,1) block for every step -> resident accumulator; axis is a
        # reduction, so mark it "arbitrary".
        out_specs=pl.BlockSpec((1, 1), lambda i: (0, 0)),
        compiler_params=pltpu.CompilerParams(dimension_semantics=("arbitrary",)),
        cost_estimate=cost,
    )(pred, target2d)

    return out[0, 0]


def _reference_loss(pred, target, *, classes=10, smoothing=0.0):
    """Pure-JAX reference mirroring the PyTorch forward."""
    confidence = 1.0 - smoothing
    logp = jax.nn.log_softmax(pred.astype(jnp.float32), axis=-1)
    true_dist = jnp.full_like(logp, smoothing / (classes - 1))
    true_dist = true_dist.at[jnp.arange(pred.shape[0]), target].set(confidence)
    return jnp.mean(jnp.sum(-true_dist * logp, axis=-1))


if __name__ == "__main__":
    B, C = 256, 10          # CIFAR-10 logits
    smoothing = 0.1

    key = jax.random.PRNGKey(0)
    k_pred, k_tgt = jax.random.split(key)
    pred_f32 = jax.random.normal(k_pred, (B, C), dtype=jnp.float32)
    target = jax.random.randint(k_tgt, (B,), 0, C, dtype=jnp.int32)

    ref = jax.block_until_ready(
        _reference_loss(pred_f32, target, classes=C, smoothing=smoothing)
    )

    # Default path: single grid step, fused mean.
    loss = jax.block_until_ready(
        label_smoothing_loss(pred_f32, target, classes=C, smoothing=smoothing)
    )
    assert jnp.allclose(loss, ref, rtol=1e-5, atol=1e-5), (loss, ref)

    # Tiled path (exercises the multi-step accumulator + pl.when init).
    loss_tiled = jax.block_until_ready(
        label_smoothing_loss(pred_f32, target, classes=C, smoothing=smoothing, tile_b=128)
    )
    assert jnp.allclose(loss_tiled, ref, rtol=1e-5, atol=1e-5), (loss_tiled, ref)

    # bf16 path: kernel DMAs native bf16 (half the HBM bytes), computes f32 inside.
    pred_bf16 = pred_f32.astype(jnp.bfloat16)
    loss_bf = jax.block_until_ready(
        label_smoothing_loss(pred_bf16, target, classes=C, smoothing=smoothing)
    )
    ref_bf = jax.block_until_ready(
        _reference_loss(pred_bf16, target, classes=C, smoothing=smoothing)
    )
    assert jnp.allclose(loss_bf, ref_bf, rtol=1e-4, atol=1e-4), (loss_bf, ref_bf)

    print("KERNEL_OK")
</pallas_src>

<mosaic_0001>
module attributes {stable_mosaic.version = 11 : i64} {
  func.func @_label_smoothing_kernel(%arg0: i32, %arg1: memref<256x10xf32, #tpu.memory_space<vmem>>, %arg2: memref<256x1xi32, #tpu.memory_space<vmem>>, %arg3: memref<1x1xf32, #tpu.memory_space<vmem>>) attributes {dimension_semantics = [#tpu.dimension_semantics<arbitrary>], iteration_bounds = array<i64: 1>, scalar_prefetch = 0 : i64, scratch_operands = 0 : i64, tpu.core_type = #tpu.core_type<tc>, window_params = [{transform_indices = @transform_0, window_bounds = array<i64: 256, 10>}, {transform_indices = @transform_1, window_bounds = array<i64: 256, 1>}, {pipeline_mode = #tpu.pipeline_mode<synchronous>, transform_indices = @transform_2, window_bounds = array<i64: 1, 1>}]} {
    %c0_i32 = arith.constant 0 : i32
    %0 = arith.cmpi eq, %arg0, %c0_i32 : i32
    %1 = arith.extui %0 : i1 to i32
    %c0_i32_0 = arith.constant 0 : i32
    %2 = arith.cmpi ne, %1, %c0_i32_0 : i32
    scf.if %2 {
      %cst_19 = arith.constant 0.000000e+00 : f32
      %43 = vector.broadcast %cst_19 : f32 to vector<1x1xf32>
      %c0_20 = arith.constant 0 : index
      %c0_21 = arith.constant 0 : index
      %44 = vector.load %arg3[%c0_20, %c0_21] : memref<1x1xf32, #tpu.memory_space<vmem>>, vector<1x1xf32>
      tpu.vector_store %arg3[%c0_20, %c0_21], %43 {strides = array<i32>} : memref<1x1xf32, #tpu.memory_space<vmem>>, vector<1x1xf32>,
    } else {
    }
    %c0 = arith.constant 0 : index
    %c0_1 = arith.constant 0 : index
    %3 = vector.load %arg1[%c0, %c0_1] : memref<256x10xf32, #tpu.memory_space<vmem>>, vector<256x10xf32>
    %cst = arith.constant dense<0xFF800000> : vector<256xf32>
    %4 = vector.multi_reduction <maximumf>, %3, %cst [1] : vector<256x10xf32> to vector<256xf32>
    %5 = vector.shape_cast %4 : vector<256xf32> to vector<256x1xf32>
    %cst_2 = arith.constant dense<0.000000e+00> : vector<256xf32>
    %6 = vector.multi_reduction <add>, %3, %cst_2 [1] : vector<256x10xf32> to vector<256xf32>
    %7 = vector.shape_cast %6 : vector<256xf32> to vector<256x1xf32>
    %8 = vector.broadcast %5 : vector<256x1xf32> to vector<256x10xf32>
    %9 = arith.subf %3, %8 : vector<256x10xf32>
    %10 = math.exp %9 : vector<256x10xf32>
    %cst_3 = arith.constant dense<0.000000e+00> : vector<256xf32>
    %11 = vector.multi_reduction <add>, %10, %cst_3 [1] : vector<256x10xf32> to vector<256xf32>
    %12 = vector.shape_cast %11 : vector<256xf32> to vector<256x1xf32>
    %13 = math.log %12 : vector<256x1xf32>
    %14 = arith.addf %5, %13 : vector<256x1xf32>
    %cst_4 = arith.constant 1.000000e+01 : f32
    %15 = vector.broadcast %cst_4 : f32 to vector<256x1xf32>
    %16 = arith.mulf %15, %14 : vector<256x1xf32>
    %17 = arith.subf %7, %16 : vector<256x1xf32>
    %18 = tpu.iota {dimensions = array<i32: 1>} : vector<256x10xi32>
    %c0_5 = arith.constant 0 : index
    %c0_6 = arith.constant 0 : index
    %19 = vector.load %arg2[%c0_5, %c0_6] : memref<256x1xi32, #tpu.memory_space<vmem>>, vector<256x1xi32>
    %20 = vector.broadcast %19 : vector<256x1xi32> to vector<256x10xi32>
    %21 = arith.cmpi eq, %18, %20 : vector<256x10xi32>
    %cst_7 = arith.constant 0.000000e+00 : f32
    %22 = vector.broadcast %cst_7 : f32 to vector<256x10xf32>
    %23 = arith.select %21, %3, %22 : vector<256x10xi1>, vector<256x10xf32>
    %cst_8 = arith.constant dense<0.000000e+00> : vector<256xf32>
    %24 = vector.multi_reduction <add>, %23, %cst_8 [1] : vector<256x10xf32> to vector<256xf32>
    %25 = vector.shape_cast %24 : vector<256xf32> to vector<256x1xf32>
    %26 = arith.subf %25, %5 : vector<256x1xf32>
    %27 = arith.subf %26, %13 : vector<256x1xf32>
    %cst_9 = arith.constant 0.0111111114 : f32
    %28 = vector.broadcast %cst_9 : f32 to vector<256x1xf32>
    %29 = arith.mulf %28, %17 : vector<256x1xf32>
    %cst_10 = arith.constant 0.899999976 : f32
    %cst_11 = arith.constant 0.0111111114 : f32
    %30 = arith.subf %cst_10, %cst_11 : f32
    %31 = vector.broadcast %30 : f32 to vector<256x1xf32>
    %32 = arith.mulf %31, %27 : vector<256x1xf32>
    %33 = arith.addf %29, %32 : vector<256x1xf32>
    %cst_12 = arith.constant 0.000000e+00 : f32
    %34 = vector.broadcast %cst_12 : f32 to vector<256x1xf32>
    %35 = arith.subf %34, %33 : vector<256x1xf32>
    %c0_13 = arith.constant 0 : index
    %c0_14 = arith.constant 0 : index
    %36 = vector.load %arg3[%c0_13, %c0_14] : memref<1x1xf32, #tpu.memory_space<vmem>>, vector<1x1xf32>
    %cst_15 = arith.constant dense<0.000000e+00> : vector<1xf32>
    %37 = vector.multi_reduction <add>, %35, %cst_15 [0] : vector<256x1xf32> to vector<1xf32>
    %38 = vector.shape_cast %37 : vector<1xf32> to vector<1x1xf32>
    %cst_16 = arith.constant 3.906250e-03 : f32
    %39 = vector.broadcast %cst_16 : f32 to vector<1x1xf32>
    %40 = arith.mulf %38, %39 : vector<1x1xf32>
    %41 = arith.addf %36, %40 : vector<1x1xf32>
    %c0_17 = arith.constant 0 : index
    %c0_18 = arith.constant 0 : index
    %42 = vector.load %arg3[%c0_17, %c0_18] : memref<1x1xf32, #tpu.memory_space<vmem>>, vector<1x1xf32>
    tpu.vector_store %arg3[%c0_17, %c0_18], %41 {strides = array<i32>} : memref<1x1xf32, #tpu.memory_space<vmem>>, vector<1x1xf32>,
    return
  }
  func.func @transform_0(%arg0: i32) -> (i32, i32) {
    %c0_i32 = arith.constant 0 : i32
    %c0_i32_0 = arith.constant 0 : i32
    return %arg0, %c0_i32 : i32, i32
  }
  func.func @transform_1(%arg0: i32) -> (i32, i32) {
    %c0_i32 = arith.constant 0 : i32
    %c0_i32_0 = arith.constant 0 : i32
    return %arg0, %c0_i32 : i32, i32
  }
  func.func @transform_2(%arg0: i32) -> (i32, i32) {
    %c0_i32 = arith.constant 0 : i32
    %c0_i32_0 = arith.constant 0 : i32
    %c0_i32_1 = arith.constant 0 : i32
    return %c0_i32, %c0_i32_0 : i32, i32
  }
}

</mosaic_0001>

<bundles_post_ra>
// kernel: tpu_custom_call.1
= control target key start
LH: loop header
LB: loop body
LE: loop exit
PB: predicated region body
PF: predicated region fallthrough
CT: control target
= control target key end

     0   :  { %vm50_vm0 = vcmask 80896   ;;  %s2487_s0 = inlined_call_operand.vmem [shape: f32[256,10], index: 0, kind: input, shape index: {}]   ;;  %s2488_s1 = inlined_call_operand.vmem [shape: s32[256,1], index: 1, kind: input, shape index: {}]   ;;  %s2489_s2 = inlined_call_operand.hbm [shape: f32[1,1], index: 2, kind: output, shape index: {}]  }
   0x1   :  { %v1341_v0 = vld [vmem:[%s2487_s0] sm:$0xff]  ;;  %v1346_v1 = vld [vmem:[%s2487_s0 + $0x10] sm:$0xff]  ;;  %v1351_v2 = vld [vmem:[%s2487_s0 + $0x8] sm:$0xff] }
   0x2   :  { %v51_v3 = vsel %vm50_vm0, %v1341_v0, -inf  ;;  %v57_v4 = vsel %vm50_vm0, %v1346_v1, -inf  ;;  %v1360_v5 = vld [vmem:[%s2487_s0 + $0x18] sm:$0xff]  ;;  %v54_v6 = vsel %vm50_vm0, %v1351_v2, -inf  ;;  %v1369_v8 = vld [vmem:[%s2487_s0 + $0x20] sm:$0xff]  ;;  %v1374_v9 = vld [vmem:[%s2487_s0 + $0x28] sm:$0xff] }
   0x3   :  { %52 = vmax.xlane.f32.xlu0 %v51_v3  ;;  %58 = vmax.xlane.f32.xlu1 %v57_v4  ;;  %v60_v7 = vsel %vm50_vm0, %v1360_v5, -inf  ;;  %v63_v10 = vsel %vm50_vm0, %v1369_v8, -inf  ;;  %v66_v11 = vsel %vm50_vm0, %v1374_v9, -inf  ;;  %v1383_v12 = vld [vmem:[%s2487_s0 + $0x30] sm:$0xff]  ;;  %v1388_v13 = vld [vmem:[%s2487_s0 + $0x38] sm:$0xff] }
   0x4   :  { %v69_v14 = vsel %vm50_vm0, %v1383_v12, -inf  ;;  %v72_v15 = vsel %vm50_vm0, %v1388_v13, -inf }
   0x7   :  { %55 = vmax.xlane.f32.xlu0 %v54_v6  ;;  %61 = vmax.xlane.f32.xlu1 %v60_v7 }
   0xb   :  { %64 = vmax.xlane.f32.xlu0 %v63_v10  ;;  %67 = vmax.xlane.f32.xlu1 %v66_v11 }
   0xc   :  { %7 = vsyncpa [#allocation3], 0  ;;  %v1397_v16 = vld [vmem:[%s2487_s0 + $0x40] sm:$0xff]  ;;  %v1402_v17 = vld [vmem:[%s2487_s0 + $0x48] sm:$0xff]  ;;  %v147_v3 = vsel %vm50_vm0, %v1341_v0, 0.0  ;;  %v150_v4 = vsel %vm50_vm0, %v1351_v2, 0.0 }
   0xd   :  { %v75_v18 = vsel %vm50_vm0, %v1397_v16, -inf  ;;  %v78_v19 = vsel %vm50_vm0, %v1402_v17, -inf  ;;  %v1411_v20 = vld [vmem:[%s2487_s0 + $0x50] sm:$0xff]  ;;  %v1416_v21 = vld [vmem:[%s2487_s0 + $0x58] sm:$0xff]  ;;  %v1425_v24 = vld [vmem:[%s2487_s0 + $0x60] sm:$0xff]  ;;  %v153_v6 = vsel %vm50_vm0, %v1346_v1, 0.0 }
   0xe   :  { %v81_v22 = vsel %vm50_vm0, %v1411_v20, -inf  ;;  %v84_v23 = vsel %vm50_vm0, %v1416_v21, -inf  ;;  %v1430_v25 = vld [vmem:[%s2487_s0 + $0x68] sm:$0xff]  ;;  %v87_v26 = vsel %vm50_vm0, %v1425_v24, -inf  ;;  %v1439_v28 = vld [vmem:[%s2487_s0 + $0x70] sm:$0xff]  ;;  %v1444_v29 = vld [vmem:[%s2487_s0 + $0x78] sm:$0xff] }
   0xf   :  { %70 = vmax.xlane.f32.xlu0 %v69_v14  ;;  %73 = vmax.xlane.f32.xlu1 %v72_v15  ;;  %v90_v27 = vsel %vm50_vm0, %v1430_v25, -inf  ;;  %v93_v30 = vsel %vm50_vm0, %v1439_v28, -inf  ;;  %v96_v31 = vsel %vm50_vm0, %v1444_v29, -inf  ;;  %v1453_v32 = vld [vmem:[%s2487_s0 + $0x80] sm:$0xff]  ;;  %v1458_v33 = vld [vmem:[%s2487_s0 + $0x88] sm:$0xff]  ;;  %v1467_v36 = vld [vmem:[%s2487_s0 + $0x90] sm:$0xff] }
  0x10   :  { %v99_v34 = vsel %vm50_vm0, %v1453_v32, -inf  ;;  %v102_v35 = vsel %vm50_vm0, %v1458_v33, -inf  ;;  %v1472_v37 = vld [vmem:[%s2487_s0 + $0x98] sm:$0xff]  ;;  %v105_v38 = vsel %vm50_vm0, %v1467_v36, -inf  ;;  %v1481_v40 = vld [vmem:[%s2487_s0 + $0xa0] sm:$0xff]  ;;  %v1486_v41 = vld [vmem:[%s2487_s0 + $0xa8] sm:$0xff] }
  0x11   :  { %v108_v39 = vsel %vm50_vm0, %v1472_v37, -inf  ;;  %v111_v42 = vsel %vm50_vm0, %v1481_v40, -inf  ;;  %v114_v43 = vsel %vm50_vm0, %v1486_v41, -inf  ;;  %v1495_v44 = vld [vmem:[%s2487_s0 + $0xb0] sm:$0xff]  ;;  %v1500_v45 = vld [vmem:[%s2487_s0 + $0xb8] sm:$0xff]  ;;  %v1509_v48 = vld [vmem:[%s2487_s0 + $0xc0] sm:$0xff] }
  0x12   :  { %v117_v46 = vsel %vm50_vm0, %v1495_v44, -inf  ;;  %v120_v47 = vsel %vm50_vm0, %v1500_v45, -inf  ;;  %v1514_v49 = vld [vmem:[%s2487_s0 + $0xc8] sm:$0xff]  ;;  %v123_v50 = vsel %vm50_vm0, %v1509_v48, -inf  ;;  %v1523_v52 = vld [vmem:[%s2487_s0 + $0xd0] sm:$0xff]  ;;  %v1528_v53 = vld [vmem:[%s2487_s0 + $0xd8] sm:$0xff] }
  0x13   :  { %76 = vmax.xlane.f32.xlu0 %v75_v18  ;;  %79 = vmax.xlane.f32.xlu1 %v78_v19  ;;  %v126_v51 = vsel %vm50_vm0, %v1514_v49, -inf  ;;  %v129_v54 = vsel %vm50_vm0, %v1523_v52, -inf  ;;  %v132_v55 = vsel %vm50_vm0, %v1528_v53, -inf  ;;  %v1537_v56 = vld [vmem:[%s2487_s0 + $0xe0] sm:$0xff]  ;;  %v1542_v57 = vld [vmem:[%s2487_s0 + $0xe8] sm:$0xff]  ;;  %v1551_v60 = vld [vmem:[%s2487_s0 + $0xf0] sm:$0xff] }
  0x14   :  { %v135_v58 = vsel %vm50_vm0, %v1537_v56, -inf  ;;  %v138_v59 = vsel %vm50_vm0, %v1542_v57, -inf  ;;  %v1556_v61 = vld [vmem:[%s2487_s0 + $0xf8] sm:$0xff]  ;;  %v141_v62 = vsel %vm50_vm0, %v1551_v60, -inf  ;;  %v156_v7 = vsel %vm50_vm0, %v1360_v5, 0.0 }
  0x15   :  { %v144_v63 = vsel %vm50_vm0, %v1556_v61, -inf  ;;  %v159_v10 = vsel %vm50_vm0, %v1369_v8, 0.0  ;;  %v162_v11 = vsel %vm50_vm0, %v1374_v9, 0.0  ;;  %v165_v14 = vsel %vm50_vm0, %v1383_v12, 0.0 }
  0x16   :  { %v168_v15 = vsel %vm50_vm0, %v1388_v13, 0.0  ;;  %v171_v18 = vsel %vm50_vm0, %v1397_v16, 0.0  ;;  %v174_v19 = vsel %vm50_vm0, %v1402_v17, 0.0 }
  0x17   :  { %82 = vmax.xlane.f32.xlu0 %v81_v22  ;;  %85 = vmax.xlane.f32.xlu1 %v84_v23  ;;  %v177_v22 = vsel %vm50_vm0, %v1411_v20, 0.0  ;;  %v180_v23 = vsel %vm50_vm0, %v1416_v21, 0.0 }
  0x1b   :  { %88 = vmax.xlane.f32.xlu0 %v87_v26  ;;  %91 = vmax.xlane.f32.xlu1 %v90_v27  ;;  %v183_v26 = vsel %vm50_vm0, %v1425_v24, 0.0  ;;  %v186_v27 = vsel %vm50_vm0, %v1430_v25, 0.0 }
  0x1f   :  { %94 = vmax.xlane.f32.xlu0 %v93_v30  ;;  %97 = vmax.xlane.f32.xlu1 %v96_v31  ;;  %v189_v30 = vsel %vm50_vm0, %v1439_v28, 0.0  ;;  %v192_v31 = vsel %vm50_vm0, %v1444_v29, 0.0 }
  0x23   :  { %100 = vmax.xlane.f32.xlu0 %v99_v34  ;;  %103 = vmax.xlane.f32.xlu1 %v102_v35  ;;  %v1320_v34 = vmov 0   ;;  %v195_v35 = vsel %vm50_vm0, %v1453_v32, 0.0 }
  0x24   :  { %1137 = vset.pattern.permute.xlu1 %v1320_v34  ;;  %1136 = vset.pattern.permute.xlu0 %v1320_v34 }
  0x27   :  { %106 = vmax.xlane.f32.xlu0 %v105_v38  ;;  %109 = vmax.xlane.f32.xlu1 %v108_v39  ;;  %v198_v38 = vsel %vm50_vm0, %v1458_v33, 0.0  ;;  %v201_v39 = vsel %vm50_vm0, %v1467_v36, 0.0 }
  0x2b   :  { %112 = vmax.xlane.f32.xlu0 %v111_v42  ;;  %115 = vmax.xlane.f32.xlu1 %v114_v43  ;;  %v204_v42 = vsel %vm50_vm0, %v1472_v37, 0.0  ;;  %v207_v43 = vsel %vm50_vm0, %v1481_v40, 0.0 }
  0x2f   :  { %118 = vmax.xlane.f32.xlu0 %v117_v46  ;;  %121 = vmax.xlane.f32.xlu1 %v120_v47  ;;  %v210_v46 = vsel %vm50_vm0, %v1486_v41, 0.0  ;;  %v213_v47 = vsel %vm50_vm0, %v1495_v44, 0.0 }
  0x33   :  { %124 = vmax.xlane.f32.xlu0 %v123_v50  ;;  %127 = vmax.xlane.f32.xlu1 %v126_v51  ;;  %v216_v50 = vsel %vm50_vm0, %v1500_v45, 0.0  ;;  %v219_v51 = vsel %vm50_vm0, %v1509_v48, 0.0 }
  0x37   :  { %130 = vmax.xlane.f32.xlu0 %v129_v54  ;;  %133 = vmax.xlane.f32.xlu1 %v132_v55  ;;  %v222_v54 = vsel %vm50_vm0, %v1514_v49, 0.0  ;;  %v225_v55 = vsel %vm50_vm0, %v1523_v52, 0.0 }
  0x3b   :  { %136 = vmax.xlane.f32.xlu0 %v135_v58  ;;  %139 = vmax.xlane.f32.xlu1 %v138_v59  ;;  %v228_v58 = vsel %vm50_vm0, %v1528_v53, 0.0  ;;  %v231_v59 = vsel %vm50_vm0, %v1537_v56, 0.0 }
  0x3f   :  { %142 = vmax.xlane.f32.xlu0 %v141_v62  ;;  %145 = vmax.xlane.f32.xlu1 %v144_v63  ;;  %v234_v62 = vsel %vm50_vm0, %v1542_v57, 0.0  ;;  %v237_v63 = vsel %vm50_vm0, %v1551_v60, 0.0 }
  0x43   :  { %148 = vadd.xlane.f32.xlu0 %v147_v3  ;;  %151 = vadd.xlane.f32.xlu1 %v150_v4  ;;  %v240_v3 = vsel %vm50_vm0, %v1556_v61, 0.0 }
  0x47   :  { %154 = vadd.xlane.f32.xlu0 %v153_v6  ;;  %157 = vadd.xlane.f32.xlu1 %v156_v7 }
  0x4b   :  { %160 = vadd.xlane.f32.xlu0 %v159_v10  ;;  %163 = vadd.xlane.f32.xlu1 %v162_v11 }
  0x4f   :  { %166 = vadd.xlane.f32.xlu0 %v165_v14  ;;  %169 = vadd.xlane.f32.xlu1 %v168_v15 }
  0x53   :  { %172 = vadd.xlane.f32.xlu0 %v171_v18  ;;  %175 = vadd.xlane.f32.xlu1 %v174_v19 }
  0x57   :  { %178 = vadd.xlane.f32.xlu0 %v177_v22  ;;  %181 = vadd.xlane.f32.xlu1 %v180_v23 }
  0x5b   :  { %184 = vadd.xlane.f32.xlu0 %v183_v26  ;;  %187 = vadd.xlane.f32.xlu1 %v186_v27 }
  0x5f   :  { %190 = vadd.xlane.f32.xlu0 %v189_v30  ;;  %193 = vadd.xlane.f32.xlu1 %v192_v31 }
  0x63   :  { %196 = vadd.xlane.f32.xlu0 %v195_v35  ;;  %199 = vadd.xlane.f32.xlu1 %v198_v38 }
  0x67   :  { %202 = vadd.xlane.f32.xlu0 %v201_v39  ;;  %205 = vadd.xlane.f32.xlu1 %v204_v42 }
  0x6b   :  { %208 = vadd.xlane.f32.xlu0 %v207_v43  ;;  %211 = vadd.xlane.f32.xlu1 %v210_v46 }
  0x6f   :  { %214 = vadd.xlane.f32.xlu0 %v213_v47  ;;  %217 = vadd.xlane.f32.xlu1 %v216_v50 }
  0x73   :  { %220 = vadd.xlane.f32.xlu0 %v219_v51  ;;  %223 = vadd.xlane.f32.xlu1 %v222_v54 }
  0x77   :  { %226 = vadd.xlane.f32.xlu0 %v225_v55  ;;  %229 = vadd.xlane.f32.xlu1 %v228_v58 }
  0x7b   :  { %232 = vadd.xlane.f32.xlu0 %v231_v59  ;;  %235 = vadd.xlane.f32.xlu1 %v234_v62 }
  0x7f   :  { %238 = vadd.xlane.f32.xlu0 %v237_v63  ;;  %241 = vadd.xlane.f32.xlu1 %v240_v3 }
  0x90   :  { %v1626_v4 = vpop.xlane.xlu0 %52  ;;  %v1628_v6 = vpop.xlane.xlu1 %58 }
  0x91   :  { %v243_v7 = vsub.f32 %v1341_v0, %v1626_v4  ;;  %v245_v10 = vsub.f32 %v1346_v1, %v1628_v6 }
  0x93   :  { %v275_v11 = vmul.f32 1.442695, %v243_v7  ;;  %v279_v14 = vmul.f32 1.442695, %v245_v10 }
  0x94   :  { %v1634_v15 = vpop.xlane.xlu0 %55  ;;  %v1636_v18 = vpop.xlane.xlu1 %61 }
  0x95   :  { %1138 = vpow2.f32 %v275_v11  ;;  %v244_v19 = vsub.f32 %v1351_v2, %v1634_v15  ;;  %v246_v22 = vsub.f32 %v1360_v5, %v1636_v18 }
  0x96   :  { %1140 = vpow2.f32 %v279_v14 }
  0x97   :  { %v277_v23 = vmul.f32 1.442695, %v244_v19  ;;  %v281_v26 = vmul.f32 1.442695, %v246_v22 }
  0x98   :  { %v1642_v27 = vpop.xlane.xlu0 %64  ;;  %v1644_v30 = vpop.xlane.xlu1 %67 }
  0x99   :  { %1142 = vpow2.f32 %v277_v23  ;;  %v247_v1 = vsub.f32 %v1369_v8, %v1642_v27  ;;  %v248_v31 = vsub.f32 %v1374_v9, %v1644_v30 }
  0x9a   :  { %1144 = vpow2.f32 %v281_v26 }
  0x9b   :  { %v283_v34 = vmul.f32 1.442695, %v247_v1  ;;  %v285_v35 = vmul.f32 1.442695, %v248_v31 }
  0x9c   :  { %v1650_v38 = vpop.xlane.xlu0 %70  ;;  %v1652_v5 = vpop.xlane.xlu1 %73 }
  0x9d   :  { %1146 = vpow2.f32 %v283_v34  ;;  %v249_v39 = vsub.f32 %v1383_v12, %v1650_v38  ;;  %v250_v42 = vsub.f32 %v1388_v13, %v1652_v5 }
  0x9e   :  { %1148 = vpow2.f32 %v285_v35 }
  0x9f   :  { %v1139_v43 = vpop.eup %1138  ;;  %v287_v8 = vmul.f32 1.442695, %v249_v39  ;;  %v289_v46 = vmul.f32 1.442695, %v250_v42 }
  0xa0   :  { %v1141_v47 = vpop.eup %1140  ;;  %v1658_v9 = vpop.xlane.xlu0 %76  ;;  %v339_v50 = vsel %vm50_vm0, %v1139_v43, 0.0 }
  0xa1   :  { %v1661_v51 = vpop.xlane.xlu1 %79  ;;  %1150 = vpow2.f32 %v287_v8  ;;  %v251_v54 = vsub.f32 %v1397_v16, %v1658_v9  ;;  %340 = vadd.xlane.f32.xlu0 %v339_v50  ;;  %v345_v13 = vsel %vm50_vm0, %v1141_v47, 0.0 }
  0xa2   :  { %v252_v12 = vsub.f32 %v1402_v17, %v1661_v51  ;;  %1152 = vpow2.f32 %v289_v46 }
  0xa3   :  { %v1143_v55 = vpop.eup %1142  ;;  %v291_v58 = vmul.f32 1.442695, %v251_v54 }
  0xa4   :  { %v293_v59 = vmul.f32 1.442695, %v252_v12  ;;  %v1145_v62 = vpop.eup %1144  ;;  %v1668_v63 = vpop.xlane.xlu0 %82  ;;  %v342_v3 = vsel %vm50_vm0, %v1143_v55, 0.0 }
  0xa5   :  { %v1671_v7 = vpop.xlane.xlu1 %85  ;;  %1154 = vpow2.f32 %v291_v58  ;;  %v253_v16 = vsub.f32 %v1411_v20, %v1668_v63  ;;  %346 = vadd.xlane.f32.xlu0 %v345_v13  ;;  %343 = vadd.xlane.f32.xlu1 %v342_v3  ;;  %v348_v10 = vsel %vm50_vm0, %v1145_v62, 0.0 }
  0xa6   :  { %v254_v17 = vsub.f32 %v1416_v21, %v1671_v7  ;;  %1156 = vpow2.f32 %v293_v59 }
  0xa7   :  { %v1147_v11 = vpop.eup %1146  ;;  %v295_v14 = vmul.f32 1.442695, %v253_v16 }
  0xa8   :  { %v297_v19 = vmul.f32 1.442695, %v254_v17  ;;  %v1149_v22 = vpop.eup %1148  ;;  %v1678_v23 = vpop.xlane.xlu0 %88  ;;  %v351_v26 = vsel %vm50_vm0, %v1147_v11, 0.0 }
  0xa9   :  { %v1681_v1 = vpop.xlane.xlu1 %91  ;;  %1158 = vpow2.f32 %v295_v14  ;;  %v255_v20 = vsub.f32 %v1425_v24, %v1678_v23  ;;  %349 = vadd.xlane.f32.xlu1 %v348_v10  ;;  %352 = vadd.xlane.f32.xlu0 %v351_v26  ;;  %v354_v31 = vsel %vm50_vm0, %v1149_v22, 0.0 }
  0xaa   :  { %v256_v21 = vsub.f32 %v1430_v25, %v1681_v1  ;;  %1160 = vpow2.f32 %v297_v19 }
  0xab   :  { %v1151_v34 = vpop.eup %1150  ;;  %v299_v35 = vmul.f32 1.442695, %v255_v20 }
  0xac   :  { %v301_v39 = vmul.f32 1.442695, %v256_v21  ;;  %v1153_v42 = vpop.eup %1152  ;;  %v1688_v43 = vpop.xlane.xlu0 %94  ;;  %v357_v8 = vsel %vm50_vm0, %v1151_v34, 0.0 }
  0xad   :  { %2522 = vst [vmem:[#allocation5_spill] sm:$0xff] %v1688_v43  ;;  %v1691_v46 = vpop.xlane.xlu1 %97  ;;  %1162 = vpow2.f32 %v299_v35  ;;  %v257_v24 = vsub.f32 %v1439_v28, %v1688_v43  ;;  %355 = vadd.xlane.f32.xlu1 %v354_v31  ;;  %358 = vadd.xlane.f32.xlu0 %v357_v8  ;;  %v360_v47 = vsel %vm50_vm0, %v1153_v42, 0.0 }
  0xae   :  { %2523 = vst [vmem:[#allocation6_spill] sm:$0xff] %v1691_v46  ;;  %v258_v25 = vsub.f32 %v1444_v29, %v1691_v46  ;;  %1164 = vpow2.f32 %v301_v39 }
  0xaf   :  { %v1155_v50 = vpop.eup %1154  ;;  %v303_v54 = vmul.f32 1.442695, %v257_v24 }
  0xb0   :  { %v305_v12 = vmul.f32 1.442695, %v258_v25  ;;  %v1157_v13 = vpop.eup %1156  ;;  %v1698_v55 = vpop.xlane.xlu0 %100  ;;  %v363_v58 = vsel %vm50_vm0, %v1155_v50, 0.0 }
  0xb1   :  { %2524 = vst [vmem:[#allocation7_spill] sm:$0xff] %v1698_v55  ;;  %v1701_v59 = vpop.xlane.xlu1 %103  ;;  %1166 = vpow2.f32 %v303_v54  ;;  %v259_v28 = vsub.f32 %v1453_v32, %v1698_v55  ;;  %361 = vadd.xlane.f32.xlu1 %v360_v47  ;;  %364 = vadd.xlane.f32.xlu0 %v363_v58  ;;  %v366_v62 = vsel %vm50_vm0, %v1157_v13, 0.0  ;;  %v595_v55 = vlaneseq }
  0xb2   :  { %2525 = vst [vmem:[#allocation8_spill] sm:$0xff] %v1701_v59  ;;  %v260_v29 = vsub.f32 %v1458_v33, %v1701_v59  ;;  %1168 = vpow2.f32 %v305_v12 }
  0xb3   :  { %v1159_v3 = vpop.eup %1158  ;;  %v307_v16 = vmul.f32 1.442695, %v259_v28  ;;  %v2000_v46 = vand.u32 127, %v595_v55  ;;  %v1266_v55 = vld [vmem:[%s2487_s0 + $0x10] sm:$0xff] }
  0xb4   :  { %v309_v17 = vmul.f32 1.442695, %v260_v29  ;;  %v1161_v10 = vpop.eup %1160  ;;  %v1708_v11 = vpop.xlane.xlu0 %106  ;;  %v369_v14 = vsel %vm50_vm0, %v1159_v3, 0.0 }
  0xb5   :  { %2526 = vst [vmem:[#allocation9_spill] sm:$0xff] %v1708_v11  ;;  %v1711_v19 = vpop.xlane.xlu1 %109  ;;  %1170 = vpow2.f32 %v307_v16  ;;  %v261_v32 = vsub.f32 %v1467_v36, %v1708_v11  ;;  %367 = vadd.xlane.f32.xlu1 %v366_v62  ;;  %370 = vadd.xlane.f32.xlu0 %v369_v14  ;;  %v372_v22 = vsel %vm50_vm0, %v1161_v10, 0.0 }
  0xb6   :  { %2527 = vst [vmem:[#allocation10_spill] sm:$0xff] %v1711_v19  ;;  %v262_v33 = vsub.f32 %v1472_v37, %v1711_v19  ;;  %1172 = vpow2.f32 %v309_v17 }
  0xb7   :  { %v1163_v26 = vpop.eup %1162  ;;  %v311_v20 = vmul.f32 1.442695, %v261_v32 }
  0xb8   :  { %v313_v21 = vmul.f32 1.442695, %v262_v33  ;;  %v1165_v31 = vpop.eup %1164  ;;  %v1718_v34 = vpop.xlane.xlu0 %112  ;;  %v375_v35 = vsel %vm50_vm0, %v1163_v26, 0.0 }
  0xb9   :  { %2528 = vst [vmem:[#allocation11_spill] sm:$0xff] %v1718_v34  ;;  %v1721_v39 = vpop.xlane.xlu1 %115  ;;  %1174 = vpow2.f32 %v311_v20  ;;  %v263_v36 = vsub.f32 %v1481_v40, %v1718_v34  ;;  %373 = vadd.xlane.f32.xlu1 %v372_v22  ;;  %376 = vadd.xlane.f32.xlu0 %v375_v35  ;;  %v378_v42 = vsel %vm50_vm0, %v1165_v31, 0.0 }
  0xba   :  { %2529 = vst [vmem:[#allocation12_spill] sm:$0xff] %v1721_v39  ;;  %v264_v37 = vsub.f32 %v1486_v41, %v1721_v39  ;;  %1176 = vpow2.f32 %v313_v21 }
  0xbb   :  { %v1167_v8 = vpop.eup %1166  ;;  %v315_v24 = vmul.f32 1.442695, %v263_v36 }
  0xbc   :  { %v317_v25 = vmul.f32 1.442695, %v264_v37  ;;  %v1169_v47 = vpop.eup %1168  ;;  %v1728_v50 = vpop.xlane.xlu0 %118  ;;  %v381_v54 = vsel %vm50_vm0, %v1167_v8, 0.0 }
  0xbd   :  { %2530 = vst [vmem:[#allocation13_spill] sm:$0xff] %v1728_v50  ;;  %v1731_v12 = vpop.xlane.xlu1 %121  ;;  %1178 = vpow2.f32 %v315_v24  ;;  %v265_v40 = vsub.f32 %v1495_v44, %v1728_v50  ;;  %379 = vadd.xlane.f32.xlu1 %v378_v42  ;;  %382 = vadd.xlane.f32.xlu0 %v381_v54  ;;  %v384_v13 = vsel %vm50_vm0, %v1169_v47, 0.0 }
  0xbe   :  { %2531 = vst [vmem:[#allocation14_spill] sm:$0xff] %v1731_v12  ;;  %v266_v41 = vsub.f32 %v1500_v45, %v1731_v12  ;;  %1180 = vpow2.f32 %v317_v25 }
  0xbf   :  { %v1171_v58 = vpop.eup %1170  ;;  %v319_v28 = vmul.f32 1.442695, %v265_v40 }
  0xc0   :  { %v321_v29 = vmul.f32 1.442695, %v266_v41  ;;  %v1173_v62 = vpop.eup %1172  ;;  %v1738_v3 = vpop.xlane.xlu0 %124  ;;  %v387_v16 = vsel %vm50_vm0, %v1171_v58, 0.0 }
  0xc1   :  { %2532 = vst [vmem:[#allocation15_spill] sm:$0xff] %v1738_v3  ;;  %v1741_v17 = vpop.xlane.xlu1 %127  ;;  %1182 = vpow2.f32 %v319_v28  ;;  %v267_v44 = vsub.f32 %v1509_v48, %v1738_v3  ;;  %385 = vadd.xlane.f32.xlu1 %v384_v13  ;;  %388 = vadd.xlane.f32.xlu0 %v387_v16  ;;  %v390_v10 = vsel %vm50_vm0, %v1173_v62, 0.0 }
  0xc2   :  { %2533 = vst [vmem:[#allocation16_spill] sm:$0xff] %v1741_v17  ;;  %v268_v45 = vsub.f32 %v1514_v49, %v1741_v17  ;;  %1184 = vpow2.f32 %v321_v29 }
  0xc3   :  { %v1175_v14 = vpop.eup %1174  ;;  %v323_v32 = vmul.f32 1.442695, %v267_v44 }
  0xc4   :  { %v325_v33 = vmul.f32 1.442695, %v268_v45  ;;  %v1177_v22 = vpop.eup %1176  ;;  %v1748_v26 = vpop.xlane.xlu0 %130  ;;  %v393_v20 = vsel %vm50_vm0, %v1175_v14, 0.0 }
  0xc5   :  { %2534 = vst [vmem:[#allocation17_spill] sm:$0xff] %v1748_v26  ;;  %v1751_v21 = vpop.xlane.xlu1 %133  ;;  %1186 = vpow2.f32 %v323_v32  ;;  %v269_v48 = vsub.f32 %v1523_v52, %v1748_v26  ;;  %391 = vadd.xlane.f32.xlu1 %v390_v10  ;;  %394 = vadd.xlane.f32.xlu0 %v393_v20  ;;  %v396_v31 = vsel %vm50_vm0, %v1177_v22, 0.0 }
  0xc6   :  { %2535 = vst [vmem:[#allocation18_spill] sm:$0xff] %v1751_v21  ;;  %v270_v49 = vsub.f32 %v1528_v53, %v1751_v21  ;;  %1188 = vpow2.f32 %v325_v33  ;;  %v615_v21 = vld [vmem:[%s2488_s1 + $0x90] sm:$0xff] }
  0xc7   :  { %v1179_v35 = vpop.eup %1178  ;;  %v327_v36 = vmul.f32 1.442695, %v269_v48 }
  0xc8   :  { %v329_v37 = vmul.f32 1.442695, %v270_v49  ;;  %v1181_v42 = vpop.eup %1180  ;;  %v1758_v8 = vpop.xlane.xlu0 %136  ;;  %v399_v24 = vsel %vm50_vm0, %v1179_v35, 0.0 }
  0xc9   :  { %2536 = vst [vmem:[#allocation19_spill] sm:$0xff] %v1758_v8  ;;  %v1761_v25 = vpop.xlane.xlu1 %139  ;;  %1190 = vpow2.f32 %v327_v36  ;;  %v271_v52 = vsub.f32 %v1537_v56, %v1758_v8  ;;  %397 = vadd.xlane.f32.xlu1 %v396_v31  ;;  %400 = vadd.xlane.f32.xlu0 %v399_v24  ;;  %v402_v47 = vsel %vm50_vm0, %v1181_v42, 0.0  ;;  %v613_v8 = vld [vmem:[%s2488_s1 + $0x80] sm:$0xff] }
  0xca   :  { %2537 = vst [vmem:[#allocation20_spill] sm:$0xff] %v1761_v25  ;;  %v272_v53 = vsub.f32 %v1542_v57, %v1761_v25  ;;  %1192 = vpow2.f32 %v329_v37 }
  0xcb   :  { %v1183_v54 = vpop.eup %1182  ;;  %v331_v40 = vmul.f32 1.442695, %v271_v52 }
  0xcc   :  { %v333_v41 = vmul.f32 1.442695, %v272_v53  ;;  %v1185_v13 = vpop.eup %1184  ;;  %v405_v58 = vsel %vm50_vm0, %v1183_v54, 0.0  ;;  %v1769_v28 = vpop.xlane.xlu0 %142  ;;  %v598_v54 = vld [vmem:[%s2488_s1 + $0x8] sm:$0xff] }
  0xcd   :  { %v1771_v29 = vpop.xlane.xlu1 %145  ;;  %1194 = vpow2.f32 %v331_v40  ;;  %403 = vadd.xlane.f32.xlu1 %v402_v47  ;;  %406 = vadd.xlane.f32.xlu0 %v405_v58  ;;  %v408_v56 = vsel %vm50_vm0, %v1185_v13, 0.0  ;;  %v597_v40 = vld [vmem:[%s2488_s1] sm:$0xff]  ;;  %v599_v13 = vld [vmem:[%s2488_s1 + $0x10] sm:$0xff]  ;;  %v606_v58 = vld [vmem:[%s2488_s1 + $0x48] sm:$0xff] }
  0xce   :  { %1196 = vpow2.f32 %v333_v41 }
  0xcf   :  { %v1187_v57 = vpop.eup %1186 }
  0xd0   :  { %v1189_v62 = vpop.eup %1188  ;;  %v411_v16 = vsel %vm50_vm0, %v1187_v57, 0.0  ;;  %v1775_v44 = vpop.xlane.xlu0 %148 }
  0xd1   :  { %409 = vadd.xlane.f32.xlu1 %v408_v56  ;;  %412 = vadd.xlane.f32.xlu0 %v411_v16  ;;  %v414_v45 = vsel %vm50_vm0, %v1189_v62, 0.0  ;;  %v1778_v10 = vpop.xlane.xlu1 %151  ;;  %v600_v62 = vld [vmem:[%s2488_s1 + $0x18] sm:$0xff] }
  0xd2   :  { %v608_v16 = vld [vmem:[%s2488_s1 + $0x58] sm:$0xff] }
  0xd3   :  { %v1191_v14 = vpop.eup %1190 }
  0xd4   :  { %v1193_v32 = vpop.eup %1192  ;;  %v417_v33 = vsel %vm50_vm0, %v1191_v14, 0.0  ;;  %v1781_v22 = vpop.xlane.xlu0 %154  ;;  %v601_v14 = vld [vmem:[%s2488_s1 + $0x20] sm:$0xff] }
  0xd5   :  { %415 = vadd.xlane.f32.xlu1 %v414_v45  ;;  %418 = vadd.xlane.f32.xlu0 %v417_v33  ;;  %v420_v20 = vsel %vm50_vm0, %v1193_v32, 0.0  ;;  %v1785_v35 = vpop.xlane.xlu1 %157  ;;  %v610_v32 = vld [vmem:[%s2488_s1 + $0x68] sm:$0xff] }
  0xd7   :  { %v1195_v48 = vpop.eup %1194 }
  0xd8   :  { %v1197_v49 = vpop.eup %1196  ;;  %v423_v31 = vsel %vm50_vm0, %v1195_v48, 0.0  ;;  %v1788_v37 = vpop.xlane.xlu0 %160  ;;  %v612_v48 = vld [vmem:[%s2488_s1 + $0x78] sm:$0xff] }
  0xd9   :  { %421 = vadd.xlane.f32.xlu1 %v420_v20  ;;  %424 = vadd.xlane.f32.xlu0 %v423_v31  ;;  %v426_v36 = vsel %vm50_vm0, %v1197_v49, 0.0  ;;  %v1790_v42 = vpop.xlane.xlu1 %163  ;;  %v602_v20 = vld [vmem:[%s2488_s1 + $0x28] sm:$0xff] }
  0xdc   :  { %v1792_v24 = vpop.xlane.xlu0 %166 }
  0xdd   :  { %427 = vadd.xlane.f32.xlu1 %v426_v36  ;;  %v1794_v52 = vpop.xlane.xlu1 %169  ;;  %v603_v36 = vld [vmem:[%s2488_s1 + $0x30] sm:$0xff] }
  0xe0   :  { %v1796_v53 = vpop.xlane.xlu0 %172 }
  0xe1   :  { %v1798_v47 = vpop.xlane.xlu1 %175 }
  0xe4   :  { %v1806_v41 = vpop.xlane.xlu0 %178 }
  0xe5   :  { %2538 = vst [vmem:[#allocation21_spill] sm:$0xff] %v1806_v41  ;;  %v1814_v56 = vpop.xlane.xlu1 %181 }
  0xe6   :  { %2539 = vst [vmem:[#allocation22_spill] sm:$0xff] %v1814_v56 }
  0xe8   :  { %v1816_v57 = vpop.xlane.xlu0 %184 }
  0xe9   :  { %2540 = vst [vmem:[#allocation23_spill] sm:$0xff] %v1816_v57  ;;  %v1824_v45 = vpop.xlane.xlu1 %187 }
  0xea   :  { %2541 = vst [vmem:[#allocation24_spill] sm:$0xff] %v1824_v45 }
  0xec   :  { %v1832_v33 = vpop.xlane.xlu0 %190 }
  0xed   :  { %2542 = vst [vmem:[#allocation25_spill] sm:$0xff] %v1832_v33  ;;  %v1840_v49 = vpop.xlane.xlu1 %193 }
  0xee   :  { %633 = vperm.xlu1 %1137, %v598_v54   ;;  %2543 = vst [vmem:[#allocation26_spill] sm:$0xff] %v1840_v49  ;;  %v614_v54 = vld [vmem:[%s2488_s1 + $0x88] sm:$0xff] }
  0xef   :  { %630 = vperm.xlu0 %1136, %v597_v40  }
  0xf0   :  { %v1842_v31 = vpop.xlane.xlu0 %196 }
  0xf1   :  { %2544 = vst [vmem:[#allocation27_spill] sm:$0xff] %v1842_v31  ;;  %v1850_v40 = vpop.xlane.xlu1 %199 }
  0xf2   :  { %636 = vperm.xlu1 %1137, %v599_v13   ;;  %2545 = vst [vmem:[#allocation28_spill] sm:$0xff] %v1850_v40  ;;  %v604_v13 = vld [vmem:[%s2488_s1 + $0x38] sm:$0xff] }
  0xf3   :  { %657 = vperm.xlu0 %1136, %v606_v58   ;;  %v616_v58 = vld [vmem:[%s2488_s1 + $0x98] sm:$0xff] }
  0xf6   :  { %639 = vperm.xlu1 %1137, %v600_v62   ;;  %v1858_v62 = vpop.xlane.xlu0 %202 }
  0xf7   :  { %663 = vperm.xlu0 %1136, %v608_v16   ;;  %2546 = vst [vmem:[#allocation29_spill] sm:$0xff] %v1858_v62  ;;  %v605_v16 = vld [vmem:[%s2488_s1 + $0x40] sm:$0xff] }
  0xfa   :  { %642 = vperm.xlu1 %1137, %v601_v14   ;;  %v618_v14 = vld [vmem:[%s2488_s1 + $0xa8] sm:$0xff] }
  0xfb   :  { %669 = vperm.xlu0 %1136, %v610_v32   ;;  %v1866_v32 = vpop.xlane.xlu1 %205 }
  0xfc   :  { %2547 = vst [vmem:[#allocation30_spill] sm:$0xff] %v1866_v32 }
  0xfe   :  { %645 = vperm.xlu1 %1137, %v602_v20   ;;  %v1868_v20 = vpop.xlane.xlu0 %208 }
  0xff   :  { %675 = vperm.xlu0 %1136, %v612_v48   ;;  %2548 = vst [vmem:[#allocation31_spill] sm:$0xff] %v1868_v20  ;;  %v607_v48 = vld [vmem:[%s2488_s1 + $0x50] sm:$0xff] }
 0x102   :  { %648 = vperm.xlu1 %1137, %v603_v36   ;;  %v620_v36 = vld [vmem:[%s2488_s1 + $0xb8] sm:$0xff] }
 0x103   :  { %681 = vperm.xlu0 %1136, %v614_v54   ;;  %v1876_v54 = vpop.xlane.xlu1 %211 }
 0x104   :  { %2549 = vst [vmem:[#allocation32_spill] sm:$0xff] %v1876_v54 }
 0x106   :  { %651 = vperm.xlu1 %1137, %v604_v13   ;;  %v609_v13 = vld [vmem:[%s2488_s1 + $0x60] sm:$0xff] }
 0x107   :  { %687 = vperm.xlu0 %1136, %v616_v58   ;;  %v622_v58 = vld [vmem:[%s2488_s1 + $0xc8] sm:$0xff] }
 0x10a   :  { %654 = vperm.xlu1 %1137, %v605_v16   ;;  %v1884_v16 = vpop.xlane.xlu0 %214 }
 0x10b   :  { %693 = vperm.xlu0 %1136, %v618_v14   ;;  %2550 = vst [vmem:[#allocation33_spill] sm:$0xff] %v1884_v16  ;;  %v611_v14 = vld [vmem:[%s2488_s1 + $0x70] sm:$0xff] }
 0x10e   :  { %660 = vperm.xlu1 %1137, %v607_v48   ;;  %v624_v48 = vld [vmem:[%s2488_s1 + $0xd8] sm:$0xff]  ;;  %v1894_v25 = vpop.xlane.xlu0 %220 }
 0x10f   :  { %699 = vperm.xlu0 %1136, %v620_v36   ;;  %v1892_v36 = vpop.xlane.xlu1 %217  ;;  %2552 = vst [vmem:[#allocation35_spill] sm:$0xff] %v1894_v25  ;;  %v617_v25 = vld [vmem:[%s2488_s1 + $0xa0] sm:$0xff] }
 0x110   :  { %2551 = vst [vmem:[#allocation34_spill] sm:$0xff] %v1892_v36 }
 0x112   :  { %666 = vperm.xlu1 %1137, %v609_v13   ;;  %v626_v13 = vld [vmem:[%s2488_s1 + $0xe8] sm:$0xff] }
 0x113   :  { %705 = vperm.xlu0 %1136, %v622_v58   ;;  %v1902_v58 = vpop.xlane.xlu1 %223 }
 0x114   :  { %2553 = vst [vmem:[#allocation36_spill] sm:$0xff] %v1902_v58  ;;  %v619_v58 = vld [vmem:[%s2488_s1 + $0xb0] sm:$0xff] }
 0x116   :  { %672 = vperm.xlu1 %1137, %v611_v14   ;;  %v628_v14 = vld [vmem:[%s2488_s1 + $0xf8] sm:$0xff] }
 0x117   :  { %711 = vperm.xlu0 %1136, %v624_v48   ;;  %v1910_v48 = vpop.xlane.xlu0 %226 }
 0x118   :  { %2554 = vst [vmem:[#allocation37_spill] sm:$0xff] %v1910_v48 }
 0x11a   :  { %678 = vperm.xlu1 %1137, %v613_v8   ;;  %v1915_v8 = vpop.xlane.xlu1 %229 }
 0x11b   :  { %717 = vperm.xlu0 %1136, %v626_v13   ;;  %2555 = vst [vmem:[#allocation38_spill] sm:$0xff] %v1915_v8  ;;  %v1917_v13 = vpop.xlane.xlu0 %232 }
 0x11c   :  { %2556 = vst [vmem:[#allocation39_spill] sm:$0xff] %v1917_v13 }
 0x11e   :  { %684 = vperm.xlu1 %1137, %v615_v21   ;;  %v1922_v36 = vpop.xlane.xlu1 %235  ;;  %v621_v21 = vld [vmem:[%s2488_s1 + $0xc0] sm:$0xff] }
 0x11f   :  { %723 = vperm.xlu0 %1136, %v628_v14   ;;  %2557 = vst [vmem:[#allocation40_spill] sm:$0xff] %v1922_v36  ;;  %v1927_v14 = vpop.xlane.xlu0 %238 }
 0x120   :  { %2558 = vst [vmem:[#allocation41_spill] sm:$0xff] %v1927_v14 }
 0x122   :  { %690 = vperm.xlu1 %1137, %v617_v25   ;;  %v623_v25 = vld [vmem:[%s2488_s1 + $0xd0] sm:$0xff]  ;;  %v1932_v8 = vpop.xlane.xlu1 %241 }
 0x123   :  { %2559 = vst [vmem:[#allocation42_spill] sm:$0xff] %v1932_v8 }
 0x126   :  { %696 = vperm.xlu1 %1137, %v619_v58   ;;  %v625_v58 = vld [vmem:[%s2488_s1 + $0xe0] sm:$0xff] }
 0x12a   :  { %702 = vperm.xlu1 %1137, %v621_v21   ;;  %v627_v21 = vld [vmem:[%s2488_s1 + $0xf0] sm:$0xff] }
 0x12e   :  { %708 = vperm.xlu1 %1137, %v623_v25   ;;  %v1934_v13 = vpop.xlane.xlu0 %340 }
 0x132   :  { %714 = vperm.xlu1 %1137, %v625_v58   ;;  %v1939_v36 = vpop.xlane.xlu1 %343  ;;  %v1941_v48 = vpop.xlane.xlu0 %346 }
 0x136   :  { %720 = vperm.xlu1 %1137, %v627_v21   ;;  %v1946_v14 = vpop.xlane.xlu1 %349  ;;  %v1948_v8 = vpop.xlane.xlu0 %352 }
 0x13a   :  { %v1950_v25 = vpop.xlane.xlu1 %355  ;;  %v1952_v26 = vpop.xlane.xlu0 %358 }
 0x13e   :  { %v1954_v17 = vpop.xlane.xlu1 %361  ;;  %v1956_v58 = vpop.xlane.xlu0 %364 }
 0x142   :  { %v1958_v16 = vpop.xlane.xlu1 %367  ;;  %v1960_v3 = vpop.xlane.xlu0 %370 }
 0x146   :  { %v1962_v54 = vpop.xlane.xlu1 %373  ;;  %v1964_v12 = vpop.xlane.xlu0 %376 }
 0x14a   :  { %v1966_v21 = vpop.xlane.xlu1 %379  ;;  %v1968_v20 = vpop.xlane.xlu0 %382 }
 0x14e   :  { %v1970_v32 = vpop.xlane.xlu1 %385  ;;  %v1972_v50 = vpop.xlane.xlu0 %388 }
 0x152   :  { %v1974_v39 = vpop.xlane.xlu1 %391  ;;  %v1976_v62 = vpop.xlane.xlu0 %394 }
 0x156   :  { %v1978_v40 = vpop.xlane.xlu1 %397  ;;  %v1980_v34 = vpop.xlane.xlu0 %400 }
 0x15a   :  { %v1982_v19 = vpop.xlane.xlu1 %403  ;;  %v1984_v31 = vpop.xlane.xlu0 %406 }
 0x15b   :  { %2560 = vst [vmem:[#allocation43_spill] sm:$0xff] %v1982_v19  ;;  %2561 = vst [vmem:[#allocation44_spill] sm:$0xff] %v1984_v31 }
 0x15e   :  { %v1986_v49 = vpop.xlane.xlu1 %409  ;;  %v1988_v33 = vpop.xlane.xlu0 %412 }
 0x15f   :  { %2562 = vst [vmem:[#allocation45_spill] sm:$0xff] %v1986_v49  ;;  %2563 = vst [vmem:[#allocation46_spill] sm:$0xff] %v1988_v33 }
 0x162   :  { %v1990_v11 = vpop.xlane.xlu1 %415  ;;  %v1992_v59 = vpop.xlane.xlu0 %418 }
 0x163   :  { %2564 = vst [vmem:[#allocation47_spill] sm:$0xff] %v1990_v11  ;;  %2565 = vst [vmem:[#allocation48_spill] sm:$0xff] %v1992_v59 }
 0x166   :  { %v1994_v45 = vpop.xlane.xlu1 %421  ;;  %v1996_v57 = vpop.xlane.xlu0 %424 }
 0x167   :  { %2566 = vst [vmem:[#allocation49_spill] sm:$0xff] %v1994_v45  ;;  %2567 = vst [vmem:[#allocation50_spill] sm:$0xff] %v1996_v57 }
 0x16a   :  { %v1998_v56 = vpop.xlane.xlu1 %427 }
 0x16b   :  { %2568 = vst [vmem:[#allocation51_spill] sm:$0xff] %v1998_v56 }
 0x16e   :  { %v634_v19 = vpop.permute.xlu1 %633  ;;  %v631_v41 = vpop.permute.xlu0 %630 }
 0x16f   :  { %vm726_vm1 = vcmp.eq.s32.totalorder %v2000_v46, %v634_v19  ;;  %vm725_vm2 = vcmp.eq.s32.totalorder %v2000_v46, %v631_v41 }
 0x170   :  { %v758_v33 = vsel %vm726_vm1, %v1351_v2, 0.0  ;;  %v757_v11 = vsel %vm725_vm2, %v1341_v0, 0.0  ;;  %v1267_v0 = vld [vmem:[%s2487_s0 + $0x18] sm:$0xff] }
 0x171   :  { %v792_v59 = vsel %vm50_vm0, %v758_v33, 0.0  ;;  %v789_v45 = vsel %vm50_vm0, %v757_v11, 0.0 }
 0x172   :  { %v637_v49 = vpop.permute.xlu1 %636  ;;  %793 = vadd.xlane.f32.xlu0 %v792_v59  ;;  %790 = vadd.xlane.f32.xlu1 %v789_v45  ;;  %v658_v56 = vpop.permute.xlu0 %657 }
 0x173   :  { %vm727_vm3 = vcmp.eq.s32.totalorder %v2000_v46, %v637_v49  ;;  %v1268_v49 = vld [vmem:[%s2487_s0 + $0x20] sm:$0xff]  ;;  %vm734_vm8 = vcmp.eq.s32.totalorder %v2000_v46, %v658_v56 }
 0x174   :  { %v759_v19 = vsel %vm727_vm3, %v1266_v55, 0.0  ;;  %v1273_v56 = vld [vmem:[%s2487_s0 + $0x40] sm:$0xff] }
 0x175   :  { %v795_v41 = vsel %vm50_vm0, %v759_v19, 0.0 }
 0x176   :  { %v640_v2 = vpop.permute.xlu1 %639  ;;  %796 = vadd.xlane.f32.xlu0 %v795_v41  ;;  %v664_v11 = vpop.permute.xlu0 %663 }
 0x177   :  { %vm728_vm4 = vcmp.eq.s32.totalorder %v2000_v46, %v640_v2  ;;  %vm736_vm10 = vcmp.eq.s32.totalorder %v2000_v46, %v664_v11 }
 0x178   :  { %v760_v59 = vsel %vm728_vm4, %v1267_v0, 0.0  ;;  %v1269_v0 = vld [vmem:[%s2487_s0 + $0x28] sm:$0xff] }
 0x179   :  { %v798_v45 = vsel %vm50_vm0, %v760_v59, 0.0 }
 0x17a   :  { %v643_v33 = vpop.permute.xlu1 %642  ;;  %799 = vadd.xlane.f32.xlu1 %v798_v45  ;;  %v670_v41 = vpop.permute.xlu0 %669 }
 0x17b   :  { %vm729_vm5 = vcmp.eq.s32.totalorder %v2000_v46, %v643_v33  ;;  %vm738_vm12 = vcmp.eq.s32.totalorder %v2000_v46, %v670_v41  ;;  %v1277_v41 = vld [vmem:[%s2487_s0 + $0x60] sm:$0xff] }
 0x17c   :  { %v761_v55 = vsel %vm729_vm5, %v1268_v49, 0.0  ;;  %v1270_v49 = vld [vmem:[%s2487_s0 + $0x30] sm:$0xff] }
 0x17d   :  { %v801_v19 = vsel %vm50_vm0, %v761_v55, 0.0 }
 0x17e   :  { %v646_v2 = vpop.permute.xlu1 %645  ;;  %802 = vadd.xlane.f32.xlu0 %v801_v19  ;;  %v676_v57 = vpop.permute.xlu0 %675 }
 0x17f   :  { %vm730_vm6 = vcmp.eq.s32.totalorder %v2000_v46, %v646_v2  ;;  %vm740_vm14 = vcmp.eq.s32.totalorder %v2000_v46, %v676_v57 }
 0x180   :  { %v762_v59 = vsel %vm730_vm6, %v1269_v0, 0.0  ;;  %v1271_v0 = vld [vmem:[%s2487_s0 + $0x38] sm:$0xff] }
 0x181   :  { %v804_v45 = vsel %vm50_vm0, %v762_v59, 0.0 }
 0x182   :  { %v649_v33 = vpop.permute.xlu1 %648  ;;  %805 = vadd.xlane.f32.xlu1 %v804_v45  ;;  %v682_v31 = vpop.permute.xlu0 %681 }
 0x183   :  { %vm731_vm7 = vcmp.eq.s32.totalorder %v2000_v46, %v649_v33  ;;  %v1272_v33 = vld [vmem:[%s2487_s0 + $0x48] sm:$0xff]  ;;  %vm742_vm1 = vcmp.eq.s32.totalorder %v2000_v46, %v682_v31 }
 0x184   :  { %v763_v55 = vsel %vm731_vm7, %v1270_v49, 0.0  ;;  %v766_v49 = vsel %vm734_vm8, %v1272_v33, 0.0 }
 0x185   :  { %v807_v19 = vsel %vm50_vm0, %v763_v55, 0.0 }
 0x186   :  { %v652_v2 = vpop.permute.xlu1 %651  ;;  %808 = vadd.xlane.f32.xlu0 %v807_v19  ;;  %v688_v11 = vpop.permute.xlu0 %687 }
 0x187   :  { %vm732_vm9 = vcmp.eq.s32.totalorder %v2000_v46, %v652_v2  ;;  %vm744_vm3 = vcmp.eq.s32.totalorder %v2000_v46, %v688_v11 }
 0x188   :  { %v764_v59 = vsel %vm732_vm9, %v1271_v0, 0.0  ;;  %v816_v0 = vsel %vm50_vm0, %v766_v49, 0.0 }
 0x189   :  { %v810_v45 = vsel %vm50_vm0, %v764_v59, 0.0  ;;  %v1274_v59 = vld [vmem:[%s2487_s0 + $0x58] sm:$0xff] }
 0x18a   :  { %v655_v55 = vpop.permute.xlu1 %654  ;;  %811 = vadd.xlane.f32.xlu1 %v810_v45  ;;  %v768_v33 = vsel %vm736_vm10, %v1274_v59, 0.0  ;;  %v1275_v45 = vld [vmem:[%s2487_s0 + $0x50] sm:$0xff]  ;;  %v694_v57 = vpop.permute.xlu0 %693 }
 0x18b   :  { %vm733_vm11 = vcmp.eq.s32.totalorder %v2000_v46, %v655_v55  ;;  %vm746_vm5 = vcmp.eq.s32.totalorder %v2000_v46, %v694_v57  ;;  %v1285_v57 = vld [vmem:[%s2487_s0 + $0xa0] sm:$0xff] }
 0x18c   :  { %v765_v19 = vsel %vm733_vm11, %v1273_v56, 0.0  ;;  %v822_v56 = vsel %vm50_vm0, %v768_v33, 0.0 }
 0x18d   :  { %v813_v2 = vsel %vm50_vm0, %v765_v19, 0.0  ;;  %v1276_v19 = vld [vmem:[%s2487_s0 + $0x68] sm:$0xff] }
 0x18e   :  { %v661_v43 = vpop.permute.xlu1 %660  ;;  %814 = vadd.xlane.f32.xlu0 %v813_v2  ;;  %817 = vadd.xlane.f32.xlu1 %v816_v0  ;;  %v770_v2 = vsel %vm738_vm12, %v1276_v19, 0.0  ;;  %v274_v19 = vsub.f32 %v1556_v61, %v1771_v29 }
 0x18f   :  { %vm735_vm13 = vcmp.eq.s32.totalorder %v2000_v46, %v661_v43  ;;  %v273_v43 = vsub.f32 %v1551_v60, %v1769_v28 }
 0x190   :  { %v767_v55 = vsel %vm735_vm13, %v1275_v45, 0.0  ;;  %v828_v45 = vsel %vm50_vm0, %v770_v2, 0.0  ;;  %v1279_v2 = vld [vmem:[%s2487_s0 + $0x70] sm:$0xff]  ;;  %v337_v61 = vmul.f32 1.442695, %v274_v19 }
 0x191   :  { %v819_v49 = vsel %vm50_vm0, %v767_v55, 0.0  ;;  %v1278_v55 = vld [vmem:[%s2487_s0 + $0x78] sm:$0xff]  ;;  %v335_v60 = vmul.f32 1.442695, %v273_v43  ;;  %v700_v43 = vpop.permute.xlu0 %699 }
 0x192   :  { %v667_v0 = vpop.permute.xlu1 %666  ;;  %820 = vadd.xlane.f32.xlu0 %v819_v49  ;;  %823 = vadd.xlane.f32.xlu1 %v822_v56  ;;  %v772_v49 = vsel %vm740_vm14, %v1278_v55, 0.0  ;;  %v1281_v55 = vld [vmem:[%s2487_s0 + $0x80] sm:$0xff]  ;;  %vm748_vm8 = vcmp.eq.s32.totalorder %v2000_v46, %v700_v43 }
 0x193   :  { %vm737_vm15 = vcmp.eq.s32.totalorder %v2000_v46, %v667_v0  ;;  %1198 = vpow2.f32 %v335_v60  ;;  %v1283_v60 = vld [vmem:[%s2487_s0 + $0x90] sm:$0xff] }
 0x194   :  { %v769_v59 = vsel %vm737_vm15, %v1277_v41, 0.0  ;;  %1200 = vpow2.f32 %v337_v61 }
 0x195   :  { %v825_v33 = vsel %vm50_vm0, %v769_v59, 0.0  ;;  %v834_v59 = vsel %vm50_vm0, %v772_v49, 0.0  ;;  %1202 = vlog2.f32 %v1934_v13 }
 0x196   :  { %v673_v56 = vpop.permute.xlu1 %672  ;;  %826 = vadd.xlane.f32.xlu0 %v825_v33  ;;  %829 = vadd.xlane.f32.xlu1 %v828_v45  ;;  %v1280_v33 = vld [vmem:[%s2487_s0 + $0x88] sm:$0xff]  ;;  %1204 = vlog2.f32 %v1939_v36 }
 0x197   :  { %vm739_vm2 = vcmp.eq.s32.totalorder %v2000_v46, %v673_v56  ;;  %v774_v31 = vsel %vm742_vm1, %v1280_v33, 0.0  ;;  %1206 = vlog2.f32 %v1941_v48 }
 0x198   :  { %v771_v0 = vsel %vm739_vm2, %v1279_v2, 0.0  ;;  %v840_v2 = vsel %vm50_vm0, %v774_v31, 0.0  ;;  %v1284_v31 = vld [vmem:[%s2487_s0 + $0xa8] sm:$0xff]  ;;  %1208 = vlog2.f32 %v1946_v14 }
 0x199   :  { %v831_v41 = vsel %vm50_vm0, %v771_v0, 0.0  ;;  %v1282_v0 = vld [vmem:[%s2487_s0 + $0x98] sm:$0xff]  ;;  %1210 = vlog2.f32 %v1948_v8 }
 0x19a   :  { %v679_v45 = vpop.permute.xlu1 %678  ;;  %832 = vadd.xlane.f32.xlu0 %v831_v41  ;;  %835 = vadd.xlane.f32.xlu1 %v834_v59  ;;  %v776_v41 = vsel %vm744_vm3, %v1282_v0, 0.0  ;;  %vm16_vm3 = vcmask 0   ;;  %1212 = vlog2.f32 %v1950_v25 }
 0x19b   :  { %vm741_vm4 = vcmp.eq.s32.totalorder %v2000_v46, %v679_v45  ;;  %v846_v33 = vsel %vm50_vm0, %v776_v41, 0.0  ;;  %v778_v45 = vsel %vm746_vm5, %v1284_v31, 0.0  ;;  %1214 = vlog2.f32 %v1952_v26 }
 0x19c   :  { %v773_v49 = vsel %vm741_vm4, %v1281_v55, 0.0  ;;  %v706_v55 = vpop.permute.xlu0 %705  ;;  %1216 = vlog2.f32 %v1954_v17 }
 0x19d   :  { %v837_v56 = vsel %vm50_vm0, %v773_v49, 0.0  ;;  %v1199_v0 = vpop.eup %1198  ;;  %vm750_vm10 = vcmp.eq.s32.totalorder %v2000_v46, %v706_v55  ;;  %1218 = vlog2.f32 %v1956_v58 }
 0x19e   :  { %v685_v11 = vpop.permute.xlu1 %684  ;;  %838 = vadd.xlane.f32.xlu0 %v837_v56  ;;  %841 = vadd.xlane.f32.xlu1 %v840_v2  ;;  %v852_v2 = vsel %vm50_vm0, %v778_v45, 0.0  ;;  %v1201_v31 = vpop.eup %1200  ;;  %v1287_v45 = vld [vmem:[%s2487_s0 + $0xb8] sm:$0xff]  ;;  %1220 = vlog2.f32 %v1958_v16 }
 0x19f   :  { %vm743_vm6 = vcmp.eq.s32.totalorder %v2000_v46, %v685_v11  ;;  %v432_v43 = vsel %vm50_vm0, %v1201_v31, 0.0  ;;  %1222 = vlog2.f32 %v1960_v3 }
 0x1a0   :  { %v775_v19 = vsel %vm743_vm6, %v1283_v60, 0.0  ;;  %v712_v11 = vpop.permute.xlu0 %711  ;;  %v1286_v60 = vld [vmem:[%s2487_s0 + $0xb0] sm:$0xff]  ;;  %1224 = vlog2.f32 %v1962_v54 }
 0x1a1   :  { %v843_v59 = vsel %vm50_vm0, %v775_v19, 0.0  ;;  %vm752_vm12 = vcmp.eq.s32.totalorder %v2000_v46, %v712_v11  ;;  %1226 = vlog2.f32 %v1964_v12 }
 0x1a2   :  { %v691_v49 = vpop.permute.xlu1 %690  ;;  %844 = vadd.xlane.f32.xlu0 %v843_v59  ;;  %847 = vadd.xlane.f32.xlu1 %v846_v33  ;;  %v429_v33 = vsel %vm50_vm0, %v1199_v0, 0.0  ;;  %1228 = vlog2.f32 %v1966_v21 }
 0x1a3   :  { %vm745_vm7 = vcmp.eq.s32.totalorder %v2000_v46, %v691_v49  ;;  %v780_v49 = vsel %vm748_vm8, %v1287_v45, 0.0  ;;  %v1291_v45 = vld [vmem:[%s2487_s0 + $0xd0] sm:$0xff]  ;;  %1230 = vlog2.f32 %v1968_v20 }
 0x1a4   :  { %v777_v61 = vsel %vm745_vm7, %v1285_v57, 0.0  ;;  %v718_v0 = vpop.permute.xlu0 %717  ;;  %1232 = vlog2.f32 %v1970_v32 }
 0x1a5   :  { %v849_v56 = vsel %vm50_vm0, %v777_v61, 0.0  ;;  %v858_v61 = vsel %vm50_vm0, %v780_v49, 0.0  ;;  %vm754_vm14 = vcmp.eq.s32.totalorder %v2000_v46, %v718_v0 }
 0x1a6   :  { %v697_v41 = vpop.permute.xlu1 %696  ;;  %850 = vadd.xlane.f32.xlu0 %v849_v56  ;;  %853 = vadd.xlane.f32.xlu1 %v852_v2  ;;  %v1288_v56 = vld [vmem:[%s2487_s0 + $0xc8] sm:$0xff] }
 0x1a7   :  { %vm747_vm9 = vcmp.eq.s32.totalorder %v2000_v46, %v697_v41  ;;  %v782_v2 = vsel %vm750_vm10, %v1288_v56, 0.0  ;;  %v1289_v41 = vld [vmem:[%s2487_s0 + $0xc0] sm:$0xff]  ;;  %v1292_v56 = vld [vmem:[%s2487_s0 + $0xe8] sm:$0xff] }
 0x1a8   :  { %v779_v19 = vsel %vm747_vm9, %v1286_v60, 0.0  ;;  %v724_v11 = vpop.permute.xlu0 %723 }
 0x1a9   :  { %v855_v59 = vsel %vm50_vm0, %v779_v19, 0.0  ;;  %vm756_vm1 = vcmp.eq.s32.totalorder %v2000_v46, %v724_v11  ;;  %v1203_v11 = vpop.eup %1202  ;;  %1234 = vlog2.f32 %v1972_v50 }
 0x1aa   :  { %v703_v57 = vpop.permute.xlu1 %702  ;;  %856 = vadd.xlane.f32.xlu0 %v855_v59  ;;  %430 = vadd.xlane.f32.xlu1 %v429_v33  ;;  %v864_v59 = vsel %vm50_vm0, %v782_v2, 0.0  ;;  %v1290_v33 = vld [vmem:[%s2487_s0 + $0xd8] sm:$0xff]  ;;  %v786_v2 = vsel %vm754_vm14, %v1292_v56, 0.0  ;;  %v2174_v36 = vmul.f32 0.6931472, %v1203_v11 }
 0x1ab   :  { %vm749_vm11 = vcmp.eq.s32.totalorder %v2000_v46, %v703_v57  ;;  %v784_v31 = vsel %vm752_vm12, %v1290_v33, 0.0 }
 0x1ac   :  { %v781_v60 = vsel %vm749_vm11, %v1289_v41, 0.0  ;;  %v1293_v41 = vld [vmem:[%s2487_s0 + $0xe0] sm:$0xff]  ;;  %v499_v17 = vadd.f32 %v2174_v36, %v1626_v4 }
 0x1ad   :  { %v861_v55 = vsel %vm50_vm0, %v781_v60, 0.0 }
 0x1ae   :  { %v709_v19 = vpop.permute.xlu1 %708  ;;  %433 = vadd.xlane.f32.xlu1 %v432_v43  ;;  %859 = vadd.xlane.f32.xlu0 %v858_v61  ;;  %v870_v61 = vsel %vm50_vm0, %v784_v31, 0.0  ;;  %v1295_v31 = vld [vmem:[%s2487_s0 + $0xf0] sm:$0xff]  ;;  %v531_v16 = vmul.f32 10.0, %v499_v17 }
 0x1af   :  { %vm751_vm13 = vcmp.eq.s32.totalorder %v2000_v46, %v709_v19 }
 0x1b0   :  { %v783_v49 = vsel %vm751_vm13, %v1291_v45, 0.0  ;;  %v563_v54 = vsub.f32 %v1775_v44, %v531_v16 }
 0x1b1   :  { %v867_v43 = vsel %vm50_vm0, %v783_v49, 0.0 }
 0x1b2   :  { %v715_v57 = vpop.permute.xlu1 %714  ;;  %862 = vadd.xlane.f32.xlu0 %v861_v55  ;;  %865 = vadd.xlane.f32.xlu1 %v864_v59  ;;  %v876_v55 = vsel %vm50_vm0, %v786_v2, 0.0  ;;  %v1294_v59 = vld [vmem:[%s2487_s0 + $0xf8] sm:$0xff]  ;;  %s1322_s0 = smov [#allocation2]  }
 0x1b3   :  { %vm753_vm15 = vcmp.eq.s32.totalorder %v2000_v46, %v715_v57  ;;  %v788_v33 = vsel %vm756_vm1, %v1294_v59, 0.0  ;;  %v1321_v57 = vmov 0.0   ;;  %s1125_s26 = sshll.u32 %s1322_s0, 4  ;;  %s1126_s26 = int_to_ptr.vmem [resolvable:$true] %s1125_s26 }
 0x1b4   :  { %v785_v60 = vsel %vm753_vm15, %v1293_v41, 0.0  ;;  %17 = vst.msk [vmem:[#allocation2] sm:$0x1] %vm16_vm3, %v1321_v57  ;;  %s1296_s27 = scalar_lea.vmem %s1126_s26, 16  ;;  %s1300_s28 = scalar_lea.vmem %s1126_s26, 32 }
 0x1b5   :  { %v873_v0 = vsel %vm50_vm0, %v785_v60, 0.0  ;;  %p1297_p0 = scmp.ne.s32.totalorder %s1126_s26, %s1296_s27  ;;  %p1301_p1 = scmp.lt.s32.totalorder %s1126_s26, %s1126_s26 }
 0x1b6   :  { %v721_v19 = vpop.permute.xlu1 %720  ;;  %868 = vadd.xlane.f32.xlu0 %v867_v43  ;;  %871 = vadd.xlane.f32.xlu1 %v870_v61  ;;  %v1205_v43 = vpop.eup %1204  ;;  %1236 = vlog2.f32 %v1974_v39  ;;  %p1302_p2 = scmp.lt.s32.totalorder %s1300_s28, %s1296_s27 }
 0x1b7   :  { %vm755_vm2 = vcmp.eq.s32.totalorder %v2000_v46, %v721_v19  ;;  %v882_v46 = vsel %vm50_vm0, %v788_v33, 0.0  ;;  %v1207_v61 = vpop.eup %1206  ;;  %v2176_v48 = vmul.f32 0.6931472, %v1205_v43  ;;  %1238 = vlog2.f32 %v1976_v62 }
 0x1b8   :  { %v787_v45 = vsel %vm755_vm2, %v1295_v31, 0.0  ;;  %v1209_v56 = vpop.eup %1208  ;;  %v2178_v14 = vmul.f32 0.6931472, %v1207_v61  ;;  %1240 = vlog2.f32 %v1978_v40  ;;  %p1303_p3 = por %p1302_p2, %p1301_p1 }
 0x1b9   :  { %v879_v49 = vsel %vm50_vm0, %v787_v45, 0.0  ;;  %v1211_v13 = vpop.eup %1210  ;;  %v2180_v8 = vmul.f32 0.6931472, %v1209_v56  ;;  %v500_v58 = vadd.f32 %v2176_v48, %v1634_v15  ;;  %1242 = vlog2.f32 %v1980_v34 }
 0x1ba   :  { %874 = vadd.xlane.f32.xlu0 %v873_v0  ;;  %877 = vadd.xlane.f32.xlu1 %v876_v55  ;;  %v1213_v25 = vpop.eup %1212  ;;  %v2182_v2 = vmul.f32 0.6931472, %v1211_v13  ;;  %v501_v41 = vadd.f32 %v2178_v14, %v1628_v6  ;;  %p1304_p4 = pnand %p1303_p3, %p1297_p0 }
 0x1bb   :  { %v1215_v26 = vpop.eup %1214  ;;  %v502_v19 = vadd.f32 %v2180_v8, %v1636_v18  ;;  %v2196_v55 = vmul.f32 0.6931472, %v1213_v25  ;;  %v532_v33 = vmul.f32 10.0, %v500_v58 }
 0x1bc   :  { %v1217_v60 = vpop.eup %1216  ;;  %v503_v0 = vadd.f32 %v2182_v2, %v1642_v27  ;;  %v2198_v59 = vmul.f32 0.6931472, %v1215_v26  ;;  %v533_v45 = vmul.f32 10.0, %v501_v41 }
 0x1bd   :  { %v1219_v31 = vpop.eup %1218  ;;  %v534_v3 = vmul.f32 10.0, %v502_v19  ;;  %v504_v57 = vadd.f32 %v2196_v55, %v1644_v30  ;;  %v564_v12 = vsub.f32 %v1778_v10, %v532_v33  ;;  %v949_v10 = vmul.f32 0.011111111, %v563_v54 }
 0x1be   :  { %880 = vadd.xlane.f32.xlu0 %v879_v49  ;;  %883 = vadd.xlane.f32.xlu1 %v882_v46  ;;  %v2202_v49 = vmul.f32 0.6931472, %v1217_v60  ;;  %v535_v46 = vmul.f32 10.0, %v503_v0  ;;  %v505_v11 = vadd.f32 %v2198_v59, %v1650_v38  ;;  %v2209_v43 = vmul.f32 0.6931472, %v1219_v31  ;;  %v1221_v21 = vpop.eup %1220 }
 0x1bf   :  { %v565_v56 = vsub.f32 %v1781_v22, %v533_v45  ;;  %v566_v13 = vsub.f32 %v1785_v35, %v534_v3  ;;  %v536_v25 = vmul.f32 10.0, %v504_v57  ;;  %v1223_v58 = vpop.eup %1222  ;;  %v950_v41 = vmul.f32 0.011111111, %v564_v12 }
 0x1c0   :  { %v506_v61 = vadd.f32 %v2202_v49, %v1652_v5  ;;  %v537_v26 = vmul.f32 10.0, %v505_v11  ;;  %v567_v17 = vsub.f32 %v1788_v37, %v535_v46  ;;  %v507_v44 = vadd.f32 %v2209_v43, %v1658_v9  ;;  %v1225_v60 = vpop.eup %1224 }
 0x1c1   :  { %v2222_v22 = vmul.f32 0.6931472, %v1221_v21  ;;  %v951_v16 = vmul.f32 0.011111111, %v565_v56  ;;  %v1227_v35 = vpop.eup %1226  ;;  %v2227_v33 = vmul.f32 0.011111111, %v566_v13  ;;  %v568_v3 = vsub.f32 %v1790_v42, %v536_v25 }
 0x1c2   :  { %v538_v19 = vmul.f32 10.0, %v506_v61  ;;  %v2229_v31 = vmul.f32 0.6931472, %v1223_v58  ;;  %v2231_v45 = vmul.f32 0.011111111, %v567_v17  ;;  %v569_v46 = vsub.f32 %v1792_v24, %v537_v26  ;;  %v1229_v57 = vpop.eup %1228 }
 0x1c3   :  { %v539_v11 = vmul.f32 10.0, %v507_v44  ;;  %v2240_v54 = vmul.f32 0.6931472, %v1225_v60  ;;  %v2242_v12 = vmul.f32 0.6931472, %v1227_v35  ;;  %v1231_v25 = vpop.eup %1230 }
 0x1c4   :  { %v570_v42 = vsub.f32 %v1794_v52, %v538_v19  ;;  %v2251_v21 = vmul.f32 0.011111111, %v568_v3  ;;  %v2253_v13 = vmul.f32 0.011111111, %v569_v46  ;;  %v1233_v58 = vpop.eup %1232 }
 0x1c5   :  { %v571_v62 = vsub.f32 %v1796_v53, %v539_v11  ;;  %v511_v60 = vadd.f32 %v2242_v12, %v1678_v23  ;;  %v2269_v3 = vmul.f32 0.6931472, %v1233_v58 }
 0x1ff   :  { %v791_v0 = vpop.xlane.xlu1 %790  ;;  %v794_v20 = vpop.xlane.xlu0 %793 }
 0x200   :  { %v885_v32 = vsub.f32 %v791_v0, %v1626_v4  ;;  %v886_v37 = vsub.f32 %v794_v20, %v1634_v15  ;;  %v508_v15 = vadd.f32 %v2222_v22, %v1661_v51  ;;  %v2261_v0 = vmul.f32 0.011111111, %v570_v42 }
 0x202   :  { %v917_v50 = vsub.f32 %v885_v32, %v2174_v36  ;;  %v918_v4 = vsub.f32 %v886_v37, %v2176_v48  ;;  %v509_v36 = vadd.f32 %v2229_v31, %v1668_v63  ;;  %v2249_v48 = vmul.f32 0.6931472, %v1229_v57  ;;  %v1235_v37 = vpop.eup %1234 }
 0x203   :  { %v797_v61 = vpop.xlane.xlu0 %796  ;;  %v540_v44 = vmul.f32 10.0, %v508_v15  ;;  %v2274_v15 = vmul.f32 0.011111111, %v571_v62 }
 0x204   :  { %v981_v24 = vmul.f32 0.88888884, %v917_v50  ;;  %v982_v56 = vmul.f32 0.88888884, %v918_v4  ;;  %v887_v39 = vsub.f32 %v797_v61, %v1628_v6  ;;  %v510_v6 = vadd.f32 %v2240_v54, %v1671_v7  ;;  %v1237_v61 = vpop.eup %1236 }
 0x205   :  { %v512_v53 = vadd.f32 %v2249_v48, %v1681_v1  ;;  %v543_v50 = vmul.f32 10.0, %v511_v60  ;;  %v2572_v60 = vld [vmem:[#allocation22_spill] sm:$0xff] }
 0x206   :  { %v1013_v26 = vadd.f32 %v981_v24, %v949_v10  ;;  %v1014_v17 = vadd.f32 %v982_v56, %v950_v41  ;;  %v919_v52 = vsub.f32 %v887_v39, %v2178_v14  ;;  %v541_v41 = vmul.f32 10.0, %v509_v36  ;;  %v2569_v36 = vld [vmem:[#allocation5_spill] sm:$0xff] }
 0x207   :  { %v800_v19 = vpop.xlane.xlu1 %799  ;;  %v2266_v14 = vmul.f32 0.6931472, %v1231_v25  ;;  %v542_v11 = vmul.f32 10.0, %v510_v6  ;;  %v544_v39 = vmul.f32 10.0, %v512_v53 }
 0x208   :  { %v1045_v20 = vsub.f32 0.0, %v1013_v26  ;;  %v1046_v35 = vsub.f32 0.0, %v1014_v17  ;;  %v983_v32 = vmul.f32 0.88888884, %v919_v52  ;;  %v888_v10 = vsub.f32 %v800_v19, %v1636_v18  ;;  %v1239_v26 = vpop.eup %1238  ;;  %v2571_v17 = vld [vmem:[#allocation6_spill] sm:$0xff] }
 0x209   :  { %v572_v18 = vsub.f32 %v1798_v47, %v540_v44  ;;  %v513_v34 = vadd.f32 %v2266_v14, %v2569_v36  ;;  %v514_v47 = vadd.f32 %v2269_v3, %v2571_v17  ;;  %v2286_v44 = vmul.f32 0.6931472, %v1237_v61  ;;  %v2577_v61 = vld [vmem:[#allocation44_spill] sm:$0xff] }
 0x20a   :  { %v1015_v46 = vadd.f32 %v983_v32, %v951_v16  ;;  %v920_v57 = vsub.f32 %v888_v10, %v2180_v8  ;;  %v1078_v42 = vadd.f32 %v1046_v35, %v1045_v20  ;;  %v2279_v16 = vmul.f32 0.6931472, %v1235_v37  ;;  %v2570_v8 = vld [vmem:[#allocation21_spill] sm:$0xff]  ;;  %v2573_v20 = vld [vmem:[#allocation23_spill] sm:$0xff] }
 0x20b   :  { %v803_v4 = vpop.xlane.xlu0 %802  ;;  %v573_v25 = vsub.f32 %v2570_v8, %v541_v41  ;;  %v2288_v6 = vmul.f32 0.011111111, %v572_v18  ;;  %v574_v19 = vsub.f32 %v2572_v60, %v542_v11  ;;  %v575_v35 = vsub.f32 %v2573_v20, %v543_v50  ;;  %v2574_v32 = vld [vmem:[#allocation43_spill] sm:$0xff]  ;;  %v2580_v20 = vld [vmem:[#allocation25_spill] sm:$0xff] }
 0x20c   :  { %v1047_v24 = vsub.f32 0.0, %v1015_v46  ;;  %v984_v56 = vmul.f32 0.88888884, %v920_v57  ;;  %v889_v40 = vsub.f32 %v803_v4, %v1642_v27  ;;  %1244 = vlog2.f32 %v2574_v32  ;;  %v2575_v46 = vld [vmem:[#allocation7_spill] sm:$0xff]  ;;  %v2576_v57 = vld [vmem:[#allocation24_spill] sm:$0xff] }
 0x20d   :  { %v545_v37 = vmul.f32 10.0, %v513_v34  ;;  %v576_v4 = vsub.f32 %v2576_v57, %v544_v39  ;;  %v546_v18 = vmul.f32 10.0, %v514_v47  ;;  %1246 = vlog2.f32 %v2577_v61 }
 0x20e   :  { %v1079_v52 = vadd.f32 %v1078_v42, %v1047_v24  ;;  %v1016_v62 = vadd.f32 %v984_v56, %v2227_v33  ;;  %v921_v58 = vsub.f32 %v889_v40, %v2182_v2  ;;  %v515_v33 = vadd.f32 %v2279_v16, %v2575_v46  ;;  %v1241_v42 = vpop.eup %1240  ;;  %v2578_v24 = vld [vmem:[#allocation8_spill] sm:$0xff] }
 0x20f   :  { %v806_v27 = vpop.xlane.xlu1 %805  ;;  %v2296_v2 = vmul.f32 0.6931472, %v1239_v26  ;;  %v516_v56 = vadd.f32 %v2286_v44, %v2578_v24  ;;  %v2304_v40 = vmul.f32 0.011111111, %v574_v19  ;;  %v2306_v34 = vmul.f32 0.011111111, %v573_v25  ;;  %v1243_v26 = vpop.eup %1242 }
 0x210   :  { %v1048_v10 = vsub.f32 0.0, %v1016_v62  ;;  %v985_v41 = vmul.f32 0.88888884, %v921_v58  ;;  %v890_v53 = vsub.f32 %v806_v27, %v1644_v30  ;;  %v2308_v8 = vmul.f32 0.011111111, %v575_v35  ;;  %v2579_v27 = vld [vmem:[#allocation9_spill] sm:$0xff] }
 0x211   :  { %v2313_v60 = vmul.f32 0.011111111, %v576_v4  ;;  %v577_v32 = vsub.f32 %v2580_v20, %v545_v37  ;;  %v2321_v57 = vmul.f32 0.6931472, %v1243_v26 }
 0x212   :  { %v1017_v11 = vadd.f32 %v985_v41, %v2231_v45  ;;  %v922_v50 = vsub.f32 %v890_v53, %v2196_v55  ;;  %v1080_v39 = vadd.f32 %v1079_v52, %v1048_v10  ;;  %v547_v45 = vmul.f32 10.0, %v515_v33  ;;  %v2581_v41 = vld [vmem:[#allocation26_spill] sm:$0xff]  ;;  %v2582_v33 = vld [vmem:[#allocation45_spill] sm:$0xff] }
 0x213   :  { %v809_v30 = vpop.xlane.xlu0 %808  ;;  %v517_v55 = vadd.f32 %v2296_v2, %v2579_v27  ;;  %v578_v53 = vsub.f32 %v2581_v41, %v546_v18  ;;  %v548_v52 = vmul.f32 10.0, %v516_v56  ;;  %v2319_v10 = vmul.f32 0.6931472, %v1241_v42 }
 0x214   :  { %v1049_v47 = vsub.f32 0.0, %v1017_v11  ;;  %v986_v62 = vmul.f32 0.88888884, %v922_v50  ;;  %v891_v58 = vsub.f32 %v809_v30, %v1650_v38  ;;  %1248 = vlog2.f32 %v2582_v33  ;;  %v2583_v50 = vld [vmem:[#allocation46_spill] sm:$0xff] }
 0x215   :  { %v549_v37 = vmul.f32 10.0, %v517_v55  ;;  %1250 = vlog2.f32 %v2583_v50  ;;  %v2587_v55 = vld [vmem:[#allocation47_spill] sm:$0xff] }
 0x216   :  { %v1081_v19 = vadd.f32 %v1080_v39, %v1049_v47  ;;  %v1018_v25 = vadd.f32 %v986_v62, %v2251_v21  ;;  %v923_v35 = vsub.f32 %v891_v58, %v2198_v59  ;;  %v2326_v21 = vmul.f32 0.011111111, %v577_v32  ;;  %v2584_v59 = vld [vmem:[#allocation27_spill] sm:$0xff]  ;;  %v1245_v18 = vpop.eup %1244  ;;  %v2585_v47 = vld [vmem:[#allocation10_spill] sm:$0xff] }
 0x217   :  { %v812_v38 = vpop.xlane.xlu1 %811  ;;  %v579_v30 = vsub.f32 %v2584_v59, %v547_v45  ;;  %v2331_v39 = vmul.f32 0.011111111, %v578_v53  ;;  %v518_v62 = vadd.f32 %v2319_v10, %v2585_v47  ;;  %v2586_v58 = vld [vmem:[#allocation11_spill] sm:$0xff]  ;;  %1252 = vlog2.f32 %v2587_v55 }
 0x218   :  { %v1050_v61 = vsub.f32 0.0, %v1018_v25  ;;  %v987_v4 = vmul.f32 0.88888884, %v923_v35  ;;  %v892_v11 = vsub.f32 %v812_v38, %v1652_v5  ;;  %v519_v5 = vadd.f32 %v2321_v57, %v2586_v58  ;;  %v2588_v25 = vld [vmem:[#allocation28_spill] sm:$0xff]  ;;  %v1247_v35 = vpop.eup %1246 }
 0x219   :  { %v580_v45 = vsub.f32 %v2588_v25, %v548_v52  ;;  %v2341_v53 = vmul.f32 0.6931472, %v1245_v18  ;;  %v2589_v38 = vld [vmem:[#allocation48_spill] sm:$0xff]  ;;  %v2344_v33 = vmul.f32 0.011111111, %v579_v30  ;;  %v2592_v25 = vld [vmem:[#allocation49_spill] sm:$0xff] }
 0x21a   :  { %v1082_v56 = vadd.f32 %v1081_v19, %v1050_v61  ;;  %v1019_v42 = vadd.f32 %v987_v4, %v2253_v13  ;;  %v924_v26 = vsub.f32 %v892_v11, %v2202_v49  ;;  %1254 = vlog2.f32 %v2589_v38  ;;  %v2590_v61 = vld [vmem:[#allocation29_spill] sm:$0xff] }
 0x21b   :  { %v818_v20 = vpop.xlane.xlu1 %817  ;;  %v815_v32 = vpop.xlane.xlu0 %814  ;;  %v581_v4 = vsub.f32 %v2590_v61, %v549_v37  ;;  %v2352_v55 = vmul.f32 0.011111111, %v580_v45  ;;  %1256 = vlog2.f32 %v2592_v25 }
 0x21c   :  { %v1051_v19 = vsub.f32 0.0, %v1019_v42  ;;  %v988_v41 = vmul.f32 0.88888884, %v924_v26  ;;  %v894_v13 = vsub.f32 %v818_v20, %v1661_v51  ;;  %v893_v49 = vsub.f32 %v815_v32, %v1658_v9 }
 0x21d   :  { %v550_v42 = vmul.f32 10.0, %v518_v62  ;;  %v551_v26 = vmul.f32 10.0, %v519_v5  ;;  %v2350_v51 = vmul.f32 0.6931472, %v1247_v35 }
 0x21e   :  { %v1083_v11 = vadd.f32 %v1082_v56, %v1051_v19  ;;  %v1020_v50 = vadd.f32 %v988_v41, %v2261_v0  ;;  %v926_v52 = vsub.f32 %v894_v13, %v2222_v22  ;;  %v925_v59 = vsub.f32 %v893_v49, %v2209_v43  ;;  %v2591_v56 = vld [vmem:[#allocation12_spill] sm:$0xff]  ;;  %v1249_v62 = vpop.eup %1248  ;;  %v2593_v13 = vld [vmem:[#allocation13_spill] sm:$0xff]  ;;  %v2594_v49 = vld [vmem:[#allocation50_spill] sm:$0xff] }
 0x21f   :  { %v824_v9 = vpop.xlane.xlu1 %823  ;;  %v821_v18 = vpop.xlane.xlu0 %820  ;;  %v520_v0 = vadd.f32 %v2341_v53, %v2591_v56  ;;  %v2359_v22 = vmul.f32 0.011111111, %v581_v4  ;;  %1258 = vlog2.f32 %v2594_v49  ;;  %v2595_v4 = vld [vmem:[#allocation30_spill] sm:$0xff] }
 0x220   :  { %v1052_v20 = vsub.f32 0.0, %v1020_v50  ;;  %v990_v30 = vmul.f32 0.88888884, %v926_v52  ;;  %v989_v32 = vmul.f32 0.88888884, %v925_v59  ;;  %v896_v37 = vsub.f32 %v824_v9, %v1671_v7  ;;  %v1251_v41 = vpop.eup %1250  ;;  %v2596_v59 = vld [vmem:[#allocation31_spill] sm:$0xff] }
 0x221   :  { %v895_v43 = vsub.f32 %v821_v18, %v1668_v63  ;;  %v521_v7 = vadd.f32 %v2350_v51, %v2593_v13  ;;  %v582_v50 = vsub.f32 %v2595_v4, %v550_v42  ;;  %v1253_v9 = vpop.eup %1252  ;;  %v2371_v18 = vmul.f32 0.6931472, %v1249_v62 }
 0x222   :  { %v1084_v5 = vadd.f32 %v1083_v11, %v1052_v20  ;;  %v1022_v35 = vadd.f32 %v990_v30, %v2288_v6  ;;  %v1021_v45 = vadd.f32 %v989_v32, %v2274_v15  ;;  %v928_v19 = vsub.f32 %v896_v37, %v2240_v54 }
 0x223   :  { %v927_v38 = vsub.f32 %v895_v43, %v2229_v31  ;;  %v830_v61 = vpop.xlane.xlu1 %829  ;;  %v827_v63 = vpop.xlane.xlu0 %826  ;;  %v583_v15 = vsub.f32 %v2596_v59, %v551_v26  ;;  %v552_v54 = vmul.f32 10.0, %v520_v0  ;;  %v2376_v43 = vmul.f32 10.0, %v521_v7 }
 0x224   :  { %v1053_v52 = vsub.f32 0.0, %v1021_v45  ;;  %v992_v11 = vmul.f32 0.88888884, %v928_v19  ;;  %v898_v6 = vsub.f32 %v830_v61, %v1681_v1  ;;  %v897_v30 = vsub.f32 %v827_v63, %v1678_v23  ;;  %v1255_v42 = vpop.eup %1254 }
 0x225   :  { %v991_v20 = vmul.f32 0.88888884, %v927_v38  ;;  %v1054_v32 = vsub.f32 0.0, %v1022_v35  ;;  %v2380_v62 = vmul.f32 0.011111111, %v582_v50  ;;  %v2598_v38 = vld [vmem:[#allocation14_spill] sm:$0xff] }
 0x226   :  { %v1085_v37 = vadd.f32 %v1084_v5, %v1053_v52  ;;  %v1024_v31 = vadd.f32 %v992_v11, %v2304_v40  ;;  %v930_v25 = vsub.f32 %v898_v6, %v2249_v48  ;;  %v929_v26 = vsub.f32 %v897_v30, %v2242_v12  ;;  %v2597_v40 = vld [vmem:[#allocation51_spill] sm:$0xff]  ;;  %v2599_v30 = vld [vmem:[#allocation32_spill] sm:$0xff] }
 0x227   :  { %v1023_v1 = vadd.f32 %v991_v20, %v2306_v34  ;;  %v836_v45 = vpop.xlane.xlu1 %835  ;;  %v833_v0 = vpop.xlane.xlu0 %832  ;;  %v2382_v19 = vmul.f32 0.6931472, %v1251_v41  ;;  %1260 = vlog2.f32 %v2597_v40  ;;  %v522_v34 = vadd.f32 %v2371_v18, %v2598_v38 }
 0x228   :  { %v1086_v23 = vadd.f32 %v1085_v37, %v1054_v32  ;;  %v994_v35 = vmul.f32 0.88888884, %v930_v25  ;;  %v900_v5 = vsub.f32 %v836_v45, %v2571_v17  ;;  %v993_v49 = vmul.f32 0.88888884, %v929_v26  ;;  %v1257_v41 = vpop.eup %1256  ;;  %v2601_v26 = vld [vmem:[#allocation33_spill] sm:$0xff] }
 0x229   :  { %v1055_v48 = vsub.f32 0.0, %v1023_v1  ;;  %v899_v7 = vsub.f32 %v833_v0, %v2569_v36  ;;  %v1056_v12 = vsub.f32 0.0, %v1024_v31  ;;  %v2390_v63 = vmul.f32 0.011111111, %v583_v15  ;;  %v2600_v15 = vld [vmem:[#allocation15_spill] sm:$0xff] }
 0x22a   :  { %v932_v61 = vsub.f32 %v900_v5, %v2269_v3  ;;  %v1026_v50 = vadd.f32 %v994_v35, %v2313_v60  ;;  %v1025_v17 = vadd.f32 %v993_v49, %v2308_v8  ;;  %v584_v32 = vsub.f32 %v2599_v30, %v552_v54  ;;  %v1259_v3 = vpop.eup %1258 }
 0x22b   :  { %v1087_v4 = vadd.f32 %v1086_v23, %v1055_v48  ;;  %v931_v52 = vsub.f32 %v899_v7, %v2266_v14  ;;  %v842_v11 = vpop.xlane.xlu1 %841  ;;  %v839_v6 = vpop.xlane.xlu0 %838  ;;  %v523_v37 = vadd.f32 %v2382_v19, %v2600_v15  ;;  %v2400_v1 = vmul.f32 10.0, %v522_v34 }
 0x22c   :  { %v996_v59 = vmul.f32 0.88888884, %v932_v61  ;;  %v902_v36 = vsub.f32 %v842_v11, %v2578_v24  ;;  %v901_v20 = vsub.f32 %v839_v6, %v2575_v46  ;;  %v1057_v25 = vsub.f32 0.0, %v1025_v17  ;;  %v2602_v11 = vld [vmem:[#allocation16_spill] sm:$0xff] }
 0x22d   :  { %v1088_v31 = vadd.f32 %v1087_v4, %v1056_v12  ;;  %v995_v60 = vmul.f32 0.88888884, %v931_v52  ;;  %v585_v24 = vsub.f32 %v2601_v26, %v2376_v43  ;;  %v1058_v45 = vsub.f32 0.0, %v1026_v50 }
 0x22e   :  { %v934_v14 = vsub.f32 %v902_v36, %v2286_v44  ;;  %v933_v8 = vsub.f32 %v901_v20, %v2279_v16  ;;  %v1028_v54 = vadd.f32 %v996_v59, %v2331_v39  ;;  %v2408_v5 = vmul.f32 0.6931472, %v1253_v9  ;;  %v2603_v20 = vld [vmem:[#allocation17_spill] sm:$0xff] }
 0x22f   :  { %v1089_v46 = vadd.f32 %v1088_v31, %v1057_v25  ;;  %v1027_v0 = vadd.f32 %v995_v60, %v2326_v21  ;;  %v848_v23 = vpop.xlane.xlu1 %847  ;;  %v845_v35 = vpop.xlane.xlu0 %844  ;;  %v970_v34 = vmul.f32 0.011111111, %v584_v32  ;;  %v2412_v43 = vmul.f32 0.6931472, %v1255_v42 }
 0x230   :  { %v998_v40 = vmul.f32 0.88888884, %v934_v14  ;;  %v997_v48 = vmul.f32 0.88888884, %v933_v8  ;;  %v904_v49 = vsub.f32 %v848_v23, %v2585_v47  ;;  %v903_v16 = vsub.f32 %v845_v35, %v2579_v27 }
 0x231   :  { %v1090_v44 = vadd.f32 %v1089_v46, %v1058_v45  ;;  %v1059_v7 = vsub.f32 0.0, %v1027_v0  ;;  %v1261_v61 = vpop.eup %1260  ;;  %v2417_v9 = vmul.f32 10.0, %v523_v37  ;;  %v1060_v4 = vsub.f32 0.0, %v1028_v54 }
 0x232   :  { %v1030_v12 = vadd.f32 %v998_v40, %v2352_v55  ;;  %v1029_v39 = vadd.f32 %v997_v48, %v2344_v33  ;;  %v936_v21 = vsub.f32 %v904_v49, %v2319_v10  ;;  %v935_v47 = vsub.f32 %v903_v16, %v2296_v2 }
 0x233   :  { %v1091_v50 = vadd.f32 %v1090_v44, %v1059_v7  ;;  %v854_v17 = vpop.xlane.xlu1 %853  ;;  %v851_v52 = vpop.xlane.xlu0 %850  ;;  %v524_v27 = vadd.f32 %v2408_v5, %v2602_v11  ;;  %v971_v36 = vmul.f32 0.011111111, %v585_v24  ;;  %v525_v30 = vadd.f32 %v2412_v43, %v2603_v20  ;;  %v2604_v24 = vld [vmem:[#allocation34_spill] sm:$0xff]  ;;  %v2606_v7 = vld [vmem:[#allocation35_spill] sm:$0xff] }
 0x234   :  { %v1061_v42 = vsub.f32 0.0, %v1029_v39  ;;  %v1000_v6 = vmul.f32 0.88888884, %v936_v21  ;;  %v906_v55 = vsub.f32 %v854_v17, %v2591_v56  ;;  %v999_v33 = vmul.f32 0.88888884, %v935_v47  ;;  %v2607_v39 = vld [vmem:[#allocation19_spill] sm:$0xff] }
 0x235   :  { %v1092_v59 = vadd.f32 %v1091_v50, %v1060_v4  ;;  %v905_v10 = vsub.f32 %v851_v52, %v2586_v58  ;;  %v2426_v32 = vmul.f32 0.6931472, %v1257_v41  ;;  %v1062_v2 = vsub.f32 0.0, %v1030_v12  ;;  %v2609_v52 = vld [vmem:[#allocation20_spill] sm:$0xff] }
 0x236   :  { %v938_v37 = vsub.f32 %v906_v55, %v2341_v53  ;;  %v1032_v25 = vadd.f32 %v1000_v6, %v2380_v62  ;;  %v1031_v60 = vadd.f32 %v999_v33, %v2359_v22  ;;  %v586_v41 = vsub.f32 %v2604_v24, %v2400_v1  ;;  %v2605_v62 = vld [vmem:[#allocation18_spill] sm:$0xff] }
 0x237   :  { %v1093_v31 = vadd.f32 %v1092_v59, %v1061_v42  ;;  %v937_v56 = vsub.f32 %v905_v10, %v2321_v57  ;;  %v431_v14 = vpop.xlane.xlu1 %430  ;;  %v857_v8 = vpop.xlane.xlu0 %856  ;;  %v2435_v45 = vmul.f32 0.6931472, %v1259_v3  ;;  %v556_v0 = vmul.f32 10.0, %v524_v27  ;;  %v2611_v24 = vld [vmem:[#allocation38_spill] sm:$0xff] }
 0x238   :  { %v1002_v26 = vmul.f32 0.88888884, %v938_v37  ;;  %1262 = vlog2.f32 %v431_v14  ;;  %v907_v58 = vsub.f32 %v857_v8, %v2593_v13  ;;  %v1063_v53 = vsub.f32 0.0, %v1031_v60 }
 0x239   :  { %v1094_v46 = vadd.f32 %v1093_v31, %v1062_v2  ;;  %v1001_v54 = vmul.f32 0.88888884, %v937_v56  ;;  %v526_v22 = vadd.f32 %v2426_v32, %v2605_v62  ;;  %v2439_v23 = vmul.f32 0.6931472, %v1261_v61 }
 0x23a   :  { %v939_v57 = vsub.f32 %v907_v58, %v2350_v51  ;;  %v1064_v35 = vsub.f32 0.0, %v1032_v25  ;;  %v1034_v48 = vadd.f32 %v1002_v26, %v970_v34  ;;  %v587_v16 = vsub.f32 %v2606_v7, %v2417_v9 }
 0x23b   :  { %v1095_v40 = vadd.f32 %v1094_v46, %v1063_v53  ;;  %v1033_v13 = vadd.f32 %v1001_v54, %v2390_v63  ;;  %v434_v49 = vpop.xlane.xlu1 %433  ;;  %v860_v1 = vpop.xlane.xlu0 %859  ;;  %v557_v12 = vmul.f32 10.0, %v525_v30  ;;  %v527_v21 = vadd.f32 %v2435_v45, %v2607_v39  ;;  %v2608_v63 = vld [vmem:[#allocation36_spill] sm:$0xff] }
 0x23c   :  { %v1003_v3 = vmul.f32 0.88888884, %v939_v57  ;;  %1264 = vlog2.f32 %v434_v49  ;;  %v908_v44 = vsub.f32 %v860_v1, %v2598_v38  ;;  %v972_v50 = vmul.f32 0.011111111, %v586_v41 }
 0x23d   :  { %v1096_v61 = vadd.f32 %v1095_v40, %v1064_v35  ;;  %v1065_v51 = vsub.f32 0.0, %v1033_v13  ;;  %v588_v47 = vsub.f32 %v2608_v63, %v556_v0  ;;  %v558_v17 = vmul.f32 10.0, %v526_v22 }
 0x23e   :  { %v1035_v4 = vadd.f32 %v1003_v3, %v971_v36  ;;  %v940_v34 = vsub.f32 %v908_v44, %v2371_v18  ;;  %v528_v27 = vadd.f32 %v2439_v23, %v2609_v52  ;;  %v1066_v38 = vsub.f32 0.0, %v1034_v48  ;;  %v2610_v18 = vld [vmem:[#allocation37_spill] sm:$0xff] }
 0x23f   :  { %v1097_v42 = vadd.f32 %v1096_v61, %v1065_v51  ;;  %v866_v6 = vpop.xlane.xlu1 %865  ;;  %v863_v9 = vpop.xlane.xlu0 %862  ;;  %v559_v36 = vmul.f32 10.0, %v527_v21  ;;  %v973_v2 = vmul.f32 0.011111111, %v587_v16  ;;  %v589_v37 = vsub.f32 %v2610_v18, %v557_v12  ;;  %v2613_v16 = vld [vmem:[#allocation40_spill] sm:$0xff]  ;;  %v2615_v18 = vld [vmem:[#allocation42_spill] sm:$0xff] }
 0x240   :  { %v1067_v55 = vsub.f32 0.0, %v1035_v4  ;;  %v1004_v59 = vmul.f32 0.88888884, %v940_v34  ;;  %v910_v33 = vsub.f32 %v866_v6, %v2602_v11  ;;  %v909_v10 = vsub.f32 %v863_v9, %v2600_v15 }
 0x241   :  { %v1098_v30 = vadd.f32 %v1097_v42, %v1066_v38  ;;  %v974_v60 = vmul.f32 0.011111111, %v588_v47  ;;  %v560_v8 = vmul.f32 10.0, %v528_v27  ;;  %v590_v41 = vsub.f32 %v2611_v24, %v558_v17 }
 0x242   :  { %v1263_v31 = vpop.eup %1262  ;;  %v1036_v25 = vadd.f32 %v1004_v59, %v972_v50  ;;  %v942_v56 = vsub.f32 %v910_v33, %v2408_v5  ;;  %v941_v14 = vsub.f32 %v909_v10, %v2382_v19  ;;  %v975_v57 = vmul.f32 0.011111111, %v589_v37  ;;  %v2612_v5 = vld [vmem:[#allocation39_spill] sm:$0xff] }
 0x243   :  { %v496_v26 = vmul.f32 0.6931472, %v1263_v31  ;;  %v1099_v58 = vadd.f32 %v1098_v30, %v1067_v55  ;;  %v872_v11 = vpop.xlane.xlu1 %871  ;;  %v869_v46 = vpop.xlane.xlu0 %868  ;;  %v591_v40 = vsub.f32 %v2612_v5, %v559_v36  ;;  %v976_v44 = vmul.f32 0.011111111, %v590_v41  ;;  %v2614_v36 = vld [vmem:[#allocation41_spill] sm:$0xff] }
 0x244   :  { %v1068_v15 = vsub.f32 0.0, %v1036_v25  ;;  %v1006_v53 = vmul.f32 0.88888884, %v942_v56  ;;  %v1005_v54 = vmul.f32 0.88888884, %v941_v14  ;;  %v912_v0 = vsub.f32 %v872_v11, %v2605_v62 }
 0x245   :  { %v529_v22 = vadd.f32 %v496_v26, %v1769_v28  ;;  %v911_v35 = vsub.f32 %v869_v46, %v2603_v20  ;;  %v592_v12 = vsub.f32 %v2613_v16, %v560_v8  ;;  %v977_v63 = vmul.f32 0.011111111, %v591_v40 }
 0x246   :  { %v1265_v19 = vpop.eup %1264  ;;  %v1100_v48 = vadd.f32 %v1099_v58, %v1068_v15  ;;  %v1038_v13 = vadd.f32 %v1006_v53, %v974_v60  ;;  %v1037_v49 = vadd.f32 %v1005_v54, %v973_v2  ;;  %v944_v1 = vsub.f32 %v912_v0, %v2426_v32 }
 0x247   :  { %v498_v3 = vmul.f32 0.6931472, %v1265_v19  ;;  %v943_v7 = vsub.f32 %v911_v35, %v2412_v43  ;;  %v878_v62 = vpop.xlane.xlu1 %877  ;;  %v875_v21 = vpop.xlane.xlu0 %874  ;;  %v561_v61 = vmul.f32 10.0, %v529_v22  ;;  %v978_v6 = vmul.f32 0.011111111, %v592_v12 }
 0x248   :  { %v1069_v51 = vsub.f32 0.0, %v1037_v49  ;;  %v1008_v4 = vmul.f32 0.88888884, %v944_v1  ;;  %v914_v20 = vsub.f32 %v878_v62, %v2609_v52  ;;  %v913_v47 = vsub.f32 %v875_v21, %v2607_v39  ;;  %v1077_v49 = vld [vmem:[#allocation2] sm:$0x1] }
 0x249   :  { %v530_v50 = vadd.f32 %v498_v3, %v1771_v29  ;;  %v1007_v34 = vmul.f32 0.88888884, %v943_v7  ;;  %v1070_v32 = vsub.f32 0.0, %v1038_v13  ;;  %v593_v30 = vsub.f32 %v2614_v36, %v561_v61 }
 0x24a   :  { %v1101_v17 = vadd.f32 %v1100_v48, %v1069_v51  ;;  %v1040_v27 = vadd.f32 %v1008_v4, %v976_v44  ;;  %v946_v43 = vsub.f32 %v914_v20, %v2439_v23  ;;  %v945_v9 = vsub.f32 %v913_v47, %v2435_v45 }
 0x24b   :  { %v562_v38 = vmul.f32 10.0, %v530_v50  ;;  %v1039_v42 = vadd.f32 %v1007_v34, %v975_v57  ;;  %v884_v55 = vpop.xlane.xlu1 %883  ;;  %v881_v59 = vpop.xlane.xlu0 %880  ;;  %v979_v11 = vmul.f32 0.011111111, %v593_v30 }
 0x24c   :  { %v1102_v33 = vadd.f32 %v1101_v17, %v1070_v32  ;;  %v1010_v52 = vmul.f32 0.88888884, %v946_v43  ;;  %v916_v10 = vsub.f32 %v884_v55, %v1771_v29  ;;  %v1009_v39 = vmul.f32 0.88888884, %v945_v9 }
 0x24d   :  { %v1071_v2 = vsub.f32 0.0, %v1039_v42  ;;  %v594_v37 = vsub.f32 %v2615_v18, %v562_v38  ;;  %v915_v31 = vsub.f32 %v881_v59, %v1769_v28  ;;  %v1072_v23 = vsub.f32 0.0, %v1040_v27 }
 0x24e   :  { %v1042_v25 = vadd.f32 %v1010_v52, %v978_v6  ;;  %v948_v60 = vsub.f32 %v916_v10, %v498_v3  ;;  %v1041_v14 = vadd.f32 %v1009_v39, %v977_v63 }
 0x24f   :  { %v1103_v56 = vadd.f32 %v1102_v33, %v1071_v2  ;;  %v980_v45 = vmul.f32 0.011111111, %v594_v37  ;;  %v947_v8 = vsub.f32 %v915_v31, %v496_v26 }
 0x250   :  { %v1012_v58 = vmul.f32 0.88888884, %v948_v60  ;;  %v1073_v41 = vsub.f32 0.0, %v1041_v14  ;;  %v1074_v46 = vsub.f32 0.0, %v1042_v25 }
 0x251   :  { %v1104_v24 = vadd.f32 %v1103_v56, %v1072_v23  ;;  %v1011_v29 = vmul.f32 0.88888884, %v947_v8 }
 0x252   :  { %v1044_v53 = vadd.f32 %v1012_v58, %v980_v45 }
 0x253   :  { %v1105_v15 = vadd.f32 %v1104_v24, %v1073_v41  ;;  %v1043_v54 = vadd.f32 %v1011_v29, %v979_v11 }
 0x254   :  { %v1076_v57 = vsub.f32 0.0, %v1044_v53 }
 0x255   :  { %v1106_v0 = vadd.f32 %v1105_v15, %v1074_v46  ;;  %v1075_v22 = vsub.f32 0.0, %v1043_v54 }
 0x257   :  { %v1107_v28 = vadd.f32 %v1106_v0, %v1075_v22 }
 0x259   :  { %v1108_v35 = vadd.f32 %v1107_v28, %v1076_v57 }
 0x25b   :  { %v1109_v5 = vrot.slane %v1108_v35, 4 }
 0x25d   :  { %v1110_v40 = vadd.f32 %v1109_v5, %v1108_v35 }
 0x25f   :  { %v1111_v19 = vrot.slane %v1110_v40, 2 }
 0x261   :  { %v1112_v48 = vadd.f32 %v1111_v19, %v1110_v40 }
 0x263   :  { %v1113_v13 = vrot.slane %v1112_v48, 1 }
 0x265   :  { %v1114_v26 = vadd.f32 %v1113_v13, %v1112_v48 }
 0x267   :  { %v1115_v1 = vmul.f32 0.00390625, %v1114_v26 }
 0x269   :  { %v1116_v3 = vadd.f32 %v1115_v1, %v1077_v49 }
 0x26b   :  { %1118 = vst.msk [vmem:[#allocation2] sm:$0x1] %vm16_vm3, %v1116_v3 }
 0x26c   :  { %1307 = shalt.err (!%p1304_p4)
}
 0x26d   :  { %s1308_s3 = scalar_lea.hbm %s2489_s2, 16 }
 0x26e   :  { %p1309_p5 = scmp.ne.s32.totalorder %s2489_s2, %s1308_s3  ;;  %p1312_p6 = scmp.lt.u32.totalorder %s1308_s3, %s2489_s2 }
 0x270   :  { %p1314_p7 = pnand %p1312_p6, %p1309_p5 }
 0x272   :  { %1317 = shalt.err (!%p1314_p7)
}
 0x273   :  { %1128 = dma.vmem_to_hbm [thread:$0]  %s1126_s26, 16, %s2489_s2, [#allocation3]  }
 0x274   :  { %1318 = dma.done.wait [#allocation3], 16  }
 0x275   :  { %1319 = vsyncadd [#allocation3], 4294967280 }
 0x276   :  { %1132 = vsyncpa [#allocation3], 1 }

</bundles_post_ra>
